<compile_context>
chip_gen: v7x
topology: tpu7x:2x2x1
jax: 0.10.0
libtpu: 0.0.40
codegen_flags: <defaults>
</compile_context>

<pallas_src>
import functools
import math

import jax
import jax.numpy as jnp
from jax.experimental import pallas as pl
from jax.experimental.pallas import tpu as pltpu  # noqa: F401  (TPU backend)

D_MODEL = 32
N_HEAD = 4
D_HEAD = D_MODEL // N_HEAD
D_FF = 64
NUM_LAYERS = 2
LN_EPS = 1e-5


def _layernorm(x, gamma, beta):
    mu = jnp.mean(x, axis=-1, keepdims=True)
    var = jnp.mean((x - mu) ** 2, axis=-1, keepdims=True)
    return (x - mu) * jax.lax.rsqrt(var + LN_EPS) * gamma + beta


def encoder_stack_kernel(src_ref, pos_ref,
                         wqk_ref, bqk_ref, wv_ref, bv_ref, wo_ref, bo_ref,
                         w1_ref, b1_ref, w2_ref, b2_ref,
                         g1_ref, be1_ref, g2_ref, be2_ref,
                         out_ref, *, batch, seq, num_layers):
    """All encoder layers for all batch elements, one kernel invocation.

    src_ref / pos_ref / out_ref: (batch*seq, D_MODEL) -- batch folded into rows.
    Weight refs carry a leading `num_layers` axis; matmul weights are bf16,
    biases / LayerNorm params are f32.
    """
    rows = batch * seq
    x = src_ref[...].astype(jnp.float32)      # (B*S, D)
    pos = pos_ref[...].astype(jnp.float32)    # (B*S, D)

    def split_heads(t, col0):
        # (B*S, >=col0+H*DH) f32 -> (H*B, S, DH): static lane slices per head,
        # stacked on a new leading axis, then the row axis (B*S) regrouped into
        # (B, S) along the sublane-tile boundary (S == 8).
        parts = [t[:, col0 + h * D_HEAD: col0 + (h + 1) * D_HEAD]
                 for h in range(N_HEAD)]
        return jnp.stack(parts, axis=0).reshape(N_HEAD * batch, seq, D_HEAD)

    for l in range(num_layers):               # static unroll: all layers fused
        # ---- fused Q|K projection and V projection on the full slab (bf16 MXU) ----
        qk_in = (x + pos).astype(jnp.bfloat16)           # pos added to q/k only
        x_bf = x.astype(jnp.bfloat16)
        # (B*S, D) @ (D, 2*H*DH); 1/sqrt(D_HEAD) already folded into the Q half.
        qk = jnp.dot(qk_in, wqk_ref[l],
                     preferred_element_type=jnp.float32) + bqk_ref[l]   # (B*S, 2D)
        v = jnp.dot(x_bf, wv_ref[l],
                    preferred_element_type=jnp.float32) + bv_ref[l]     # (B*S, D)

        # ---- attention batched over all B*H (batch, head) pairs ----
        q_h = split_heads(qk, 0).astype(jnp.bfloat16)          # (H*B, S, DH)
        k_h = split_heads(qk, D_MODEL).astype(jnp.bfloat16)    # (H*B, S, DH)
        v_h = split_heads(v, 0).astype(jnp.bfloat16)           # (H*B, S, DH)

        logits = jnp.einsum('nqd,nkd->nqk', q_h, k_h,
                            preferred_element_type=jnp.float32)  # (H*B, S, S)
        m = jnp.max(logits, axis=-1, keepdims=True)
        e = jnp.exp(logits - m)
        p = e * pl.reciprocal(jnp.sum(e, axis=-1, keepdims=True), approx=True)
        o_h = jnp.einsum('nqk,nkd->nqd', p.astype(jnp.bfloat16), v_h,
                         preferred_element_type=jnp.float32)      # (H*B, S, DH)

        # Reassemble heads along lanes -> (B*S, H*DH), then ONE out-proj matmul
        # with contraction D_MODEL (instead of H contraction-DH matmuls + sum).
        o_hb = o_h.reshape(N_HEAD, rows, D_HEAD)
        o_cat = jnp.concatenate([o_hb[h] for h in range(N_HEAD)], axis=-1)
        attn = jnp.dot(o_cat.astype(jnp.bfloat16), wo_ref[l],
                       preferred_element_type=jnp.float32) + bo_ref[l]   # (B*S, D)

        # ---- residual + LN, FFN, residual + LN (full slab) ----
        x1 = _layernorm(x + attn, g1_ref[l], be1_ref[l])
        hid = jnp.maximum(
            jnp.dot(x1.astype(jnp.bfloat16), w1_ref[l],
                    preferred_element_type=jnp.float32) + b1_ref[l], 0.0)
        ff = jnp.dot(hid.astype(jnp.bfloat16), w2_ref[l],
                     preferred_element_type=jnp.float32) + b2_ref[l]
        x = _layernorm(x1 + ff, g2_ref[l], be2_ref[l])

    out_ref[...] = x.astype(out_ref.dtype)


def pack_layer_params(layer_params):
    """Stack per-layer params into layer-major kernel operands.

    Returns 14 arrays, each with a leading NUM_LAYERS axis:
      wqk (L,D,2D) bf16, bqk (L,1,2D) f32, wv (L,D,D) bf16, bv (L,1,D) f32,
      wo (L,D,D) bf16, bo (L,1,D) f32, w1 (L,D,DFF) bf16, b1 (L,1,DFF) f32,
      w2 (L,DFF,D) bf16, b2 (L,1,D) f32, g1/be1/g2/be2 (L,1,D) f32.
    The attention scale 1/sqrt(D_HEAD) is folded into the Q weight/bias half.
    Matmul weights are cast to bf16 once here (MXU-native; halves weight VMEM).
    """
    scale = 1.0 / math.sqrt(D_HEAD)
    packed = [[] for _ in range(14)]
    for (wq, wk, wv, bq, bk, bv, wo, bo,
         w1, b1, w2, b2, g1, be1, g2, be2) in layer_params:
        vals = (
            jnp.concatenate([wq * scale, wk], axis=-1).astype(jnp.bfloat16),
            jnp.concatenate([bq * scale, bk], axis=-1),
            wv.astype(jnp.bfloat16), bv,
            wo.astype(jnp.bfloat16), bo,
            w1.astype(jnp.bfloat16), b1,
            w2.astype(jnp.bfloat16), b2,
            g1, be1, g2, be2,
        )
        for acc, v in zip(packed, vals):
            acc.append(v)
    return [jnp.stack(v) for v in packed]


def transformer_encoder_apply(src, pos, layer_params, norm=None):
    """TransformerEncoder.forward: all layers fused into a single pallas_call."""
    B, S, D = src.shape
    assert D == D_MODEL
    packed = pack_layer_params(layer_params)
    kernel = functools.partial(encoder_stack_kernel, batch=B, seq=S,
                               num_layers=len(layer_params))
    # Single gridless invocation: activations + all stacked (bf16) weights live in
    # VMEM for the whole kernel (a few hundred KB here) -> one launch, one
    # HBM->VMEM copy per operand, no per-layer HBM round-trips.
    out2 = pl.pallas_call(
        kernel,
        out_shape=jax.ShapeDtypeStruct((B * S, D), src.dtype),
    )(src.reshape(B * S, D), pos.reshape(B * S, D), *packed)
    output = out2.reshape(B, S, D)
    if norm is not None:
        gamma, beta = norm
        output = _layernorm(output, gamma, beta)
    return output


def init_layer_params(key):
    """Deterministic per-layer parameters (PyTorch nn.MultiheadAttention / Linear
    shapes, stored transposed so the math is x @ W)."""
    ks = jax.random.split(key, 8)
    s = 0.02
    wq = jax.random.normal(ks[0], (D_MODEL, D_MODEL), jnp.float32) * s
    wk = jax.random.normal(ks[1], (D_MODEL, D_MODEL), jnp.float32) * s
    wv = jax.random.normal(ks[2], (D_MODEL, D_MODEL), jnp.float32) * s
    bq = jnp.zeros((1, D_MODEL), jnp.float32)
    bk = jnp.zeros((1, D_MODEL), jnp.float32)
    bv = jnp.zeros((1, D_MODEL), jnp.float32)
    wo = jax.random.normal(ks[3], (D_MODEL, D_MODEL), jnp.float32) * s
    bo = jnp.zeros((1, D_MODEL), jnp.float32)
    w1 = jax.random.normal(ks[4], (D_MODEL, D_FF), jnp.float32) * s
    b1 = jax.random.normal(ks[5], (1, D_FF), jnp.float32) * s
    w2 = jax.random.normal(ks[6], (D_FF, D_MODEL), jnp.float32) * s
    b2 = jax.random.normal(ks[7], (1, D_MODEL), jnp.float32) * s
    g1 = jnp.ones((1, D_MODEL), jnp.float32)
    be1 = jnp.zeros((1, D_MODEL), jnp.float32)
    g2 = jnp.ones((1, D_MODEL), jnp.float32)
    be2 = jnp.zeros((1, D_MODEL), jnp.float32)
    return [wq, wk, wv, bq, bk, bv, wo, bo, w1, b1, w2, b2, g1, be1, g2, be2]


def reference_layer(src, pos, params):
    """Pure-JAX f32 reference mirroring the PyTorch encoder layer (sanity check)."""
    (wq, wk, wv, bq, bk, bv, wo, bo, w1, b1, w2, b2, g1, be1, g2, be2) = params
    qk_in = src + pos
    q = qk_in @ wq + bq
    k = qk_in @ wk + bk
    v = src @ wv + bv
    B, S, D = src.shape
    qh = q.reshape(B, S, N_HEAD, D_HEAD).transpose(0, 2, 1, 3) / math.sqrt(D_HEAD)
    kh = k.reshape(B, S, N_HEAD, D_HEAD).transpose(0, 2, 1, 3)
    vh = v.reshape(B, S, N_HEAD, D_HEAD).transpose(0, 2, 1, 3)
    logits = jnp.einsum('bhqd,bhkd->bhqk', qh, kh)
    p = jax.nn.softmax(logits, axis=-1)
    ah = jnp.einsum('bhqk,bhkd->bhqd', p, vh)
    attn = ah.transpose(0, 2, 1, 3).reshape(B, S, D) @ wo + bo
    x1 = _layernorm(src + attn, g1, be1)
    ff = jnp.maximum(x1 @ w1 + b1, 0.0) @ w2 + b2
    return _layernorm(x1 + ff, g2, be2)


if __name__ == "__main__":
    B, S = 2, 8
    key = jax.random.PRNGKey(0)
    k_src, k_pos, k_params = jax.random.split(key, 3)
    src = jax.random.normal(k_src, (B, S, D_MODEL), jnp.float32)
    pos = jax.random.normal(k_pos, (B, S, D_MODEL), jnp.float32)

    layer_keys = jax.random.split(k_params, NUM_LAYERS)
    layer_params = [init_layer_params(k) for k in layer_keys]

    out = transformer_encoder_apply(src, pos, layer_params, norm=None)
    out = jax.block_until_ready(out)

    # Sanity check against a pure-JAX f32 reference.  The tolerance covers the
    # bf16 matmul operands and the approximate softmax reciprocal used on the
    # TPU fast path (observed error is a few 1e-3).
    ref = src
    for params in layer_params:
        ref = reference_layer(ref, pos, params)
    assert out.shape == (B, S, D_MODEL)
    assert jnp.allclose(out, ref, atol=2e-2, rtol=2e-2), "mismatch vs reference"

    print("KERNEL_OK")
</pallas_src>

<mosaic_0001>
module attributes {stable_mosaic.version = 11 : i64} {
  func.func @encoder_stack_kernel(%arg0: memref<16x32xf32, #tpu.memory_space<vmem>>, %arg1: memref<16x32xf32, #tpu.memory_space<vmem>>, %arg2: memref<2x32x64xbf16, #tpu.memory_space<vmem>>, %arg3: memref<2x1x64xf32, #tpu.memory_space<vmem>>, %arg4: memref<2x32x32xbf16, #tpu.memory_space<vmem>>, %arg5: memref<2x1x32xf32, #tpu.memory_space<vmem>>, %arg6: memref<2x32x32xbf16, #tpu.memory_space<vmem>>, %arg7: memref<2x1x32xf32, #tpu.memory_space<vmem>>, %arg8: memref<2x32x64xbf16, #tpu.memory_space<vmem>>, %arg9: memref<2x1x64xf32, #tpu.memory_space<vmem>>, %arg10: memref<2x64x32xbf16, #tpu.memory_space<vmem>>, %arg11: memref<2x1x32xf32, #tpu.memory_space<vmem>>, %arg12: memref<2x1x32xf32, #tpu.memory_space<vmem>>, %arg13: memref<2x1x32xf32, #tpu.memory_space<vmem>>, %arg14: memref<2x1x32xf32, #tpu.memory_space<vmem>>, %arg15: memref<2x1x32xf32, #tpu.memory_space<vmem>>, %arg16: memref<16x32xf32, #tpu.memory_space<vmem>>) attributes {dimension_semantics = [], scalar_prefetch = 0 : i64, scratch_operands = 0 : i64, tpu.core_type = #tpu.core_type<tc>} {
    %c0 = arith.constant 0 : index
    %c0_0 = arith.constant 0 : index
    %0 = vector.load %arg0[%c0, %c0_0] : memref<16x32xf32, #tpu.memory_space<vmem>>, vector<16x32xf32>
    %c0_1 = arith.constant 0 : index
    %c0_2 = arith.constant 0 : index
    %1 = vector.load %arg1[%c0_1, %c0_2] : memref<16x32xf32, #tpu.memory_space<vmem>>, vector<16x32xf32>
    %2 = arith.addf %0, %1 : vector<16x32xf32>
    %3 = arith.truncf %2 : vector<16x32xf32> to vector<16x32xbf16>
    %4 = arith.truncf %0 : vector<16x32xf32> to vector<16x32xbf16>
    %c0_3 = arith.constant 0 : index
    %c0_4 = arith.constant 0 : index
    %c0_5 = arith.constant 0 : index
    %5 = vector.load %arg2[%c0_3, %c0_4, %c0_5] : memref<2x32x64xbf16, #tpu.memory_space<vmem>>, vector<1x32x64xbf16>
    %6 = vector.shape_cast %5 : vector<1x32x64xbf16> to vector<32x64xbf16>
    %cst = arith.constant dense<0.000000e+00> : vector<16x64xf32>
    %7 = tpu.matmul %3, %6, %cst {dimension_numbers = #tpu.dot_dimension_numbers<[1], [0], [0], [1], [0, 0, 1, 1], [], []>} : vector<16x32xbf16>, vector<32x64xbf16>, vector<16x64xf32> -> vector<16x64xf32>
    %c0_6 = arith.constant 0 : index
    %c0_7 = arith.constant 0 : index
    %c0_8 = arith.constant 0 : index
    %8 = vector.load %arg3[%c0_6, %c0_7, %c0_8] : memref<2x1x64xf32, #tpu.memory_space<vmem>>, vector<1x1x64xf32>
    %9 = vector.shape_cast %8 : vector<1x1x64xf32> to vector<1x64xf32>
    %10 = vector.broadcast %9 : vector<1x64xf32> to vector<16x64xf32>
    %11 = arith.addf %7, %10 : vector<16x64xf32>
    %c0_9 = arith.constant 0 : index
    %c0_10 = arith.constant 0 : index
    %c0_11 = arith.constant 0 : index
    %12 = vector.load %arg4[%c0_9, %c0_10, %c0_11] : memref<2x32x32xbf16, #tpu.memory_space<vmem>>, vector<1x32x32xbf16>
    %13 = vector.shape_cast %12 : vector<1x32x32xbf16> to vector<32x32xbf16>
    %cst_12 = arith.constant dense<0.000000e+00> : vector<16x32xf32>
    %14 = tpu.matmul %4, %13, %cst_12 {dimension_numbers = #tpu.dot_dimension_numbers<[1], [0], [0], [1], [0, 0, 1, 1], [], []>} : vector<16x32xbf16>, vector<32x32xbf16>, vector<16x32xf32> -> vector<16x32xf32>
    %c0_13 = arith.constant 0 : index
    %c0_14 = arith.constant 0 : index
    %c0_15 = arith.constant 0 : index
    %15 = vector.load %arg5[%c0_13, %c0_14, %c0_15] : memref<2x1x32xf32, #tpu.memory_space<vmem>>, vector<1x1x32xf32>
    %16 = vector.shape_cast %15 : vector<1x1x32xf32> to vector<1x32xf32>
    %17 = vector.broadcast %16 : vector<1x32xf32> to vector<16x32xf32>
    %18 = arith.addf %14, %17 : vector<16x32xf32>
    %19 = vector.extract_strided_slice %11 {offsets = [0, 0], sizes = [16, 8], strides = [1, 1]} : vector<16x64xf32> to vector<16x8xf32>
    %20 = vector.extract_strided_slice %11 {offsets = [0, 8], sizes = [16, 8], strides = [1, 1]} : vector<16x64xf32> to vector<16x8xf32>
    %21 = vector.extract_strided_slice %11 {offsets = [0, 16], sizes = [16, 8], strides = [1, 1]} : vector<16x64xf32> to vector<16x8xf32>
    %22 = vector.extract_strided_slice %11 {offsets = [0, 24], sizes = [16, 8], strides = [1, 1]} : vector<16x64xf32> to vector<16x8xf32>
    %23 = vector.shape_cast %19 : vector<16x8xf32> to vector<1x16x8xf32>
    %24 = vector.shape_cast %20 : vector<16x8xf32> to vector<1x16x8xf32>
    %25 = vector.shape_cast %21 : vector<16x8xf32> to vector<1x16x8xf32>
    %26 = vector.shape_cast %22 : vector<16x8xf32> to vector<1x16x8xf32>
    %27 = tpu.concatenate %23, %24, %25, %26 in 0 : vector<1x16x8xf32>, vector<1x16x8xf32>, vector<1x16x8xf32>, vector<1x16x8xf32> -> vector<4x16x8xf32>
    %28 = vector.shape_cast %27 : vector<4x16x8xf32> to vector<8x8x8xf32>
    %29 = arith.truncf %28 : vector<8x8x8xf32> to vector<8x8x8xbf16>
    %30 = vector.extract_strided_slice %11 {offsets = [0, 32], sizes = [16, 8], strides = [1, 1]} : vector<16x64xf32> to vector<16x8xf32>
    %31 = vector.extract_strided_slice %11 {offsets = [0, 40], sizes = [16, 8], strides = [1, 1]} : vector<16x64xf32> to vector<16x8xf32>
    %32 = vector.extract_strided_slice %11 {offsets = [0, 48], sizes = [16, 8], strides = [1, 1]} : vector<16x64xf32> to vector<16x8xf32>
    %33 = vector.extract_strided_slice %11 {offsets = [0, 56], sizes = [16, 8], strides = [1, 1]} : vector<16x64xf32> to vector<16x8xf32>
    %34 = vector.shape_cast %30 : vector<16x8xf32> to vector<1x16x8xf32>
    %35 = vector.shape_cast %31 : vector<16x8xf32> to vector<1x16x8xf32>
    %36 = vector.shape_cast %32 : vector<16x8xf32> to vector<1x16x8xf32>
    %37 = vector.shape_cast %33 : vector<16x8xf32> to vector<1x16x8xf32>
    %38 = tpu.concatenate %34, %35, %36, %37 in 0 : vector<1x16x8xf32>, vector<1x16x8xf32>, vector<1x16x8xf32>, vector<1x16x8xf32> -> vector<4x16x8xf32>
    %39 = vector.shape_cast %38 : vector<4x16x8xf32> to vector<8x8x8xf32>
    %40 = arith.truncf %39 : vector<8x8x8xf32> to vector<8x8x8xbf16>
    %41 = vector.extract_strided_slice %18 {offsets = [0, 0], sizes = [16, 8], strides = [1, 1]} : vector<16x32xf32> to vector<16x8xf32>
    %42 = vector.extract_strided_slice %18 {offsets = [0, 8], sizes = [16, 8], strides = [1, 1]} : vector<16x32xf32> to vector<16x8xf32>
    %43 = vector.extract_strided_slice %18 {offsets = [0, 16], sizes = [16, 8], strides = [1, 1]} : vector<16x32xf32> to vector<16x8xf32>
    %44 = vector.extract_strided_slice %18 {offsets = [0, 24], sizes = [16, 8], strides = [1, 1]} : vector<16x32xf32> to vector<16x8xf32>
    %45 = vector.shape_cast %41 : vector<16x8xf32> to vector<1x16x8xf32>
    %46 = vector.shape_cast %42 : vector<16x8xf32> to vector<1x16x8xf32>
    %47 = vector.shape_cast %43 : vector<16x8xf32> to vector<1x16x8xf32>
    %48 = vector.shape_cast %44 : vector<16x8xf32> to vector<1x16x8xf32>
    %49 = tpu.concatenate %45, %46, %47, %48 in 0 : vector<1x16x8xf32>, vector<1x16x8xf32>, vector<1x16x8xf32>, vector<1x16x8xf32> -> vector<4x16x8xf32>
    %50 = vector.shape_cast %49 : vector<4x16x8xf32> to vector<8x8x8xf32>
    %51 = arith.truncf %50 : vector<8x8x8xf32> to vector<8x8x8xbf16>
    "tpu.trace_start"() <{level = 10 : i32, message = "nqd,nkd->nqk"}> : () -> ()
    %cst_16 = arith.constant dense<0.000000e+00> : vector<8x8x8xf32>
    %52 = tpu.matmul %29, %40, %cst_16 {dimension_numbers = #tpu.dot_dimension_numbers<[2], [2], [1], [1], [0, 0, 0, 1, 1, 1], [0], [0]>} : vector<8x8x8xbf16>, vector<8x8x8xbf16>, vector<8x8x8xf32> -> vector<8x8x8xf32>
    "tpu.trace_stop"() : () -> ()
    %cst_17 = arith.constant dense<0xFF800000> : vector<8x8xf32>
    %53 = vector.multi_reduction <maximumf>, %52, %cst_17 [2] : vector<8x8x8xf32> to vector<8x8xf32>
    %54 = vector.shape_cast %53 : vector<8x8xf32> to vector<8x8x1xf32>
    %55 = vector.broadcast %54 : vector<8x8x1xf32> to vector<8x8x8xf32>
    %56 = arith.subf %52, %55 : vector<8x8x8xf32>
    %57 = math.exp %56 : vector<8x8x8xf32>
    %cst_18 = arith.constant dense<0.000000e+00> : vector<8x8xf32>
    %58 = vector.multi_reduction <add>, %57, %cst_18 [2] : vector<8x8x8xf32> to vector<8x8xf32>
    %59 = vector.shape_cast %58 : vector<8x8xf32> to vector<8x8x1xf32>
    %60 = tpu.reciprocal %59 {approx = true} : vector<8x8x1xf32> -> vector<8x8x1xf32>
    %61 = vector.broadcast %60 : vector<8x8x1xf32> to vector<8x8x8xf32>
    %62 = arith.mulf %57, %61 : vector<8x8x8xf32>
    %63 = arith.truncf %62 : vector<8x8x8xf32> to vector<8x8x8xbf16>
    "tpu.trace_start"() <{level = 10 : i32, message = "nqk,nkd->nqd"}> : () -> ()
    %cst_19 = arith.constant dense<0.000000e+00> : vector<8x8x8xf32>
    %64 = tpu.matmul %63, %51, %cst_19 {dimension_numbers = #tpu.dot_dimension_numbers<[2], [1], [1], [2], [0, 0, 0, 1, 1, 2], [0], [0]>} : vector<8x8x8xbf16>, vector<8x8x8xbf16>, vector<8x8x8xf32> -> vector<8x8x8xf32>
    "tpu.trace_stop"() : () -> ()
    %65 = vector.shape_cast %64 : vector<8x8x8xf32> to vector<4x16x8xf32>
    %66 = vector.extract_strided_slice %65 {offsets = [0, 0, 0], sizes = [1, 16, 8], strides = [1, 1, 1]} : vector<4x16x8xf32> to vector<1x16x8xf32>
    %67 = vector.shape_cast %66 : vector<1x16x8xf32> to vector<16x8xf32>
    %68 = vector.extract_strided_slice %65 {offsets = [1, 0, 0], sizes = [1, 16, 8], strides = [1, 1, 1]} : vector<4x16x8xf32> to vector<1x16x8xf32>
    %69 = vector.shape_cast %68 : vector<1x16x8xf32> to vector<16x8xf32>
    %70 = vector.extract_strided_slice %65 {offsets = [2, 0, 0], sizes = [1, 16, 8], strides = [1, 1, 1]} : vector<4x16x8xf32> to vector<1x16x8xf32>
    %71 = vector.shape_cast %70 : vector<1x16x8xf32> to vector<16x8xf32>
    %72 = vector.extract_strided_slice %65 {offsets = [3, 0, 0], sizes = [1, 16, 8], strides = [1, 1, 1]} : vector<4x16x8xf32> to vector<1x16x8xf32>
    %73 = vector.shape_cast %72 : vector<1x16x8xf32> to vector<16x8xf32>
    %74 = tpu.concatenate %67, %69, %71, %73 in 1 : vector<16x8xf32>, vector<16x8xf32>, vector<16x8xf32>, vector<16x8xf32> -> vector<16x32xf32>
    %75 = arith.truncf %74 : vector<16x32xf32> to vector<16x32xbf16>
    %c0_20 = arith.constant 0 : index
    %c0_21 = arith.constant 0 : index
    %c0_22 = arith.constant 0 : index
    %76 = vector.load %arg6[%c0_20, %c0_21, %c0_22] : memref<2x32x32xbf16, #tpu.memory_space<vmem>>, vector<1x32x32xbf16>
    %77 = vector.shape_cast %76 : vector<1x32x32xbf16> to vector<32x32xbf16>
    %cst_23 = arith.constant dense<0.000000e+00> : vector<16x32xf32>
    %78 = tpu.matmul %75, %77, %cst_23 {dimension_numbers = #tpu.dot_dimension_numbers<[1], [0], [0], [1], [0, 0, 1, 1], [], []>} : vector<16x32xbf16>, vector<32x32xbf16>, vector<16x32xf32> -> vector<16x32xf32>
    %c0_24 = arith.constant 0 : index
    %c0_25 = arith.constant 0 : index
    %c0_26 = arith.constant 0 : index
    %79 = vector.load %arg7[%c0_24, %c0_25, %c0_26] : memref<2x1x32xf32, #tpu.memory_space<vmem>>, vector<1x1x32xf32>
    %80 = vector.shape_cast %79 : vector<1x1x32xf32> to vector<1x32xf32>
    %81 = vector.broadcast %80 : vector<1x32xf32> to vector<16x32xf32>
    %82 = arith.addf %78, %81 : vector<16x32xf32>
    %83 = arith.addf %0, %82 : vector<16x32xf32>
    %c0_27 = arith.constant 0 : index
    %c0_28 = arith.constant 0 : index
    %c0_29 = arith.constant 0 : index
    %84 = vector.load %arg12[%c0_27, %c0_28, %c0_29] : memref<2x1x32xf32, #tpu.memory_space<vmem>>, vector<1x1x32xf32>
    %85 = vector.shape_cast %84 : vector<1x1x32xf32> to vector<1x32xf32>
    %c0_30 = arith.constant 0 : index
    %c0_31 = arith.constant 0 : index
    %c0_32 = arith.constant 0 : index
    %86 = vector.load %arg13[%c0_30, %c0_31, %c0_32] : memref<2x1x32xf32, #tpu.memory_space<vmem>>, vector<1x1x32xf32>
    %87 = vector.shape_cast %86 : vector<1x1x32xf32> to vector<1x32xf32>
    %cst_33 = arith.constant dense<0.000000e+00> : vector<16xf32>
    %88 = vector.multi_reduction <add>, %83, %cst_33 [1] : vector<16x32xf32> to vector<16xf32>
    %89 = vector.shape_cast %88 : vector<16xf32> to vector<16x1xf32>
    %cst_34 = arith.constant 3.200000e+01 : f32
    %90 = vector.broadcast %cst_34 : f32 to vector<16x1xf32>
    %91 = arith.divf %89, %90 : vector<16x1xf32>
    %92 = vector.broadcast %91 : vector<16x1xf32> to vector<16x32xf32>
    %93 = arith.subf %83, %92 : vector<16x32xf32>
    %94 = arith.mulf %93, %93 : vector<16x32xf32>
    %cst_35 = arith.constant dense<0.000000e+00> : vector<16xf32>
    %95 = vector.multi_reduction <add>, %94, %cst_35 [1] : vector<16x32xf32> to vector<16xf32>
    %96 = vector.shape_cast %95 : vector<16xf32> to vector<16x1xf32>
    %cst_36 = arith.constant 3.200000e+01 : f32
    %97 = vector.broadcast %cst_36 : f32 to vector<16x1xf32>
    %98 = arith.divf %96, %97 : vector<16x1xf32>
    %99 = vector.broadcast %91 : vector<16x1xf32> to vector<16x32xf32>
    %100 = arith.subf %83, %99 : vector<16x32xf32>
    %cst_37 = arith.constant 9.99999974E-6 : f32
    %101 = vector.broadcast %cst_37 : f32 to vector<16x1xf32>
    %102 = arith.addf %98, %101 : vector<16x1xf32>
    %103 = math.rsqrt %102 : vector<16x1xf32>
    %104 = vector.broadcast %103 : vector<16x1xf32> to vector<16x32xf32>
    %105 = arith.mulf %100, %104 : vector<16x32xf32>
    %106 = vector.broadcast %85 : vector<1x32xf32> to vector<16x32xf32>
    %107 = arith.mulf %105, %106 : vector<16x32xf32>
    %108 = vector.broadcast %87 : vector<1x32xf32> to vector<16x32xf32>
    %109 = arith.addf %107, %108 : vector<16x32xf32>
    %110 = arith.truncf %109 : vector<16x32xf32> to vector<16x32xbf16>
    %c0_38 = arith.constant 0 : index
    %c0_39 = arith.constant 0 : index
    %c0_40 = arith.constant 0 : index
    %111 = vector.load %arg8[%c0_38, %c0_39, %c0_40] : memref<2x32x64xbf16, #tpu.memory_space<vmem>>, vector<1x32x64xbf16>
    %112 = vector.shape_cast %111 : vector<1x32x64xbf16> to vector<32x64xbf16>
    %cst_41 = arith.constant dense<0.000000e+00> : vector<16x64xf32>
    %113 = tpu.matmul %110, %112, %cst_41 {dimension_numbers = #tpu.dot_dimension_numbers<[1], [0], [0], [1], [0, 0, 1, 1], [], []>} : vector<16x32xbf16>, vector<32x64xbf16>, vector<16x64xf32> -> vector<16x64xf32>
    %c0_42 = arith.constant 0 : index
    %c0_43 = arith.constant 0 : index
    %c0_44 = arith.constant 0 : index
    %114 = vector.load %arg9[%c0_42, %c0_43, %c0_44] : memref<2x1x64xf32, #tpu.memory_space<vmem>>, vector<1x1x64xf32>
    %115 = vector.shape_cast %114 : vector<1x1x64xf32> to vector<1x64xf32>
    %116 = vector.broadcast %115 : vector<1x64xf32> to vector<16x64xf32>
    %117 = arith.addf %113, %116 : vector<16x64xf32>
    %cst_45 = arith.constant 0.000000e+00 : f32
    %118 = vector.broadcast %cst_45 : f32 to vector<16x64xf32>
    %119 = arith.maximumf %117, %118 : vector<16x64xf32>
    %120 = arith.truncf %119 : vector<16x64xf32> to vector<16x64xbf16>
    %c0_46 = arith.constant 0 : index
    %c0_47 = arith.constant 0 : index
    %c0_48 = arith.constant 0 : index
    %121 = vector.load %arg10[%c0_46, %c0_47, %c0_48] : memref<2x64x32xbf16, #tpu.memory_space<vmem>>, vector<1x64x32xbf16>
    %122 = vector.shape_cast %121 : vector<1x64x32xbf16> to vector<64x32xbf16>
    %cst_49 = arith.constant dense<0.000000e+00> : vector<16x32xf32>
    %123 = tpu.matmul %120, %122, %cst_49 {dimension_numbers = #tpu.dot_dimension_numbers<[1], [0], [0], [1], [0, 0, 1, 1], [], []>} : vector<16x64xbf16>, vector<64x32xbf16>, vector<16x32xf32> -> vector<16x32xf32>
    %c0_50 = arith.constant 0 : index
    %c0_51 = arith.constant 0 : index
    %c0_52 = arith.constant 0 : index
    %124 = vector.load %arg11[%c0_50, %c0_51, %c0_52] : memref<2x1x32xf32, #tpu.memory_space<vmem>>, vector<1x1x32xf32>
    %125 = vector.shape_cast %124 : vector<1x1x32xf32> to vector<1x32xf32>
    %126 = vector.broadcast %125 : vector<1x32xf32> to vector<16x32xf32>
    %127 = arith.addf %123, %126 : vector<16x32xf32>
    %128 = arith.addf %109, %127 : vector<16x32xf32>
    %c0_53 = arith.constant 0 : index
    %c0_54 = arith.constant 0 : index
    %c0_55 = arith.constant 0 : index
    %129 = vector.load %arg14[%c0_53, %c0_54, %c0_55] : memref<2x1x32xf32, #tpu.memory_space<vmem>>, vector<1x1x32xf32>
    %130 = vector.shape_cast %129 : vector<1x1x32xf32> to vector<1x32xf32>
    %c0_56 = arith.constant 0 : index
    %c0_57 = arith.constant 0 : index
    %c0_58 = arith.constant 0 : index
    %131 = vector.load %arg15[%c0_56, %c0_57, %c0_58] : memref<2x1x32xf32, #tpu.memory_space<vmem>>, vector<1x1x32xf32>
    %132 = vector.shape_cast %131 : vector<1x1x32xf32> to vector<1x32xf32>
    %cst_59 = arith.constant dense<0.000000e+00> : vector<16xf32>
    %133 = vector.multi_reduction <add>, %128, %cst_59 [1] : vector<16x32xf32> to vector<16xf32>
    %134 = vector.shape_cast %133 : vector<16xf32> to vector<16x1xf32>
    %cst_60 = arith.constant 3.200000e+01 : f32
    %135 = vector.broadcast %cst_60 : f32 to vector<16x1xf32>
    %136 = arith.divf %134, %135 : vector<16x1xf32>
    %137 = vector.broadcast %136 : vector<16x1xf32> to vector<16x32xf32>
    %138 = arith.subf %128, %137 : vector<16x32xf32>
    %139 = arith.mulf %138, %138 : vector<16x32xf32>
    %cst_61 = arith.constant dense<0.000000e+00> : vector<16xf32>
    %140 = vector.multi_reduction <add>, %139, %cst_61 [1] : vector<16x32xf32> to vector<16xf32>
    %141 = vector.shape_cast %140 : vector<16xf32> to vector<16x1xf32>
    %cst_62 = arith.constant 3.200000e+01 : f32
    %142 = vector.broadcast %cst_62 : f32 to vector<16x1xf32>
    %143 = arith.divf %141, %142 : vector<16x1xf32>
    %144 = vector.broadcast %136 : vector<16x1xf32> to vector<16x32xf32>
    %145 = arith.subf %128, %144 : vector<16x32xf32>
    %cst_63 = arith.constant 9.99999974E-6 : f32
    %146 = vector.broadcast %cst_63 : f32 to vector<16x1xf32>
    %147 = arith.addf %143, %146 : vector<16x1xf32>
    %148 = math.rsqrt %147 : vector<16x1xf32>
    %149 = vector.broadcast %148 : vector<16x1xf32> to vector<16x32xf32>
    %150 = arith.mulf %145, %149 : vector<16x32xf32>
    %151 = vector.broadcast %130 : vector<1x32xf32> to vector<16x32xf32>
    %152 = arith.mulf %150, %151 : vector<16x32xf32>
    %153 = vector.broadcast %132 : vector<1x32xf32> to vector<16x32xf32>
    %154 = arith.addf %152, %153 : vector<16x32xf32>
    %155 = arith.addf %154, %1 : vector<16x32xf32>
    %156 = arith.truncf %155 : vector<16x32xf32> to vector<16x32xbf16>
    %157 = arith.truncf %154 : vector<16x32xf32> to vector<16x32xbf16>
    %c1 = arith.constant 1 : index
    %c0_64 = arith.constant 0 : index
    %c0_65 = arith.constant 0 : index
    %158 = vector.load %arg2[%c1, %c0_64, %c0_65] : memref<2x32x64xbf16, #tpu.memory_space<vmem>>, vector<1x32x64xbf16>
    %159 = vector.shape_cast %158 : vector<1x32x64xbf16> to vector<32x64xbf16>
    %cst_66 = arith.constant dense<0.000000e+00> : vector<16x64xf32>
    %160 = tpu.matmul %156, %159, %cst_66 {dimension_numbers = #tpu.dot_dimension_numbers<[1], [0], [0], [1], [0, 0, 1, 1], [], []>} : vector<16x32xbf16>, vector<32x64xbf16>, vector<16x64xf32> -> vector<16x64xf32>
    %c1_67 = arith.constant 1 : index
    %c0_68 = arith.constant 0 : index
    %c0_69 = arith.constant 0 : index
    %161 = vector.load %arg3[%c1_67, %c0_68, %c0_69] : memref<2x1x64xf32, #tpu.memory_space<vmem>>, vector<1x1x64xf32>
    %162 = vector.shape_cast %161 : vector<1x1x64xf32> to vector<1x64xf32>
    %163 = vector.broadcast %162 : vector<1x64xf32> to vector<16x64xf32>
    %164 = arith.addf %160, %163 : vector<16x64xf32>
    %c1_70 = arith.constant 1 : index
    %c0_71 = arith.constant 0 : index
    %c0_72 = arith.constant 0 : index
    %165 = vector.load %arg4[%c1_70, %c0_71, %c0_72] : memref<2x32x32xbf16, #tpu.memory_space<vmem>>, vector<1x32x32xbf16>
    %166 = vector.shape_cast %165 : vector<1x32x32xbf16> to vector<32x32xbf16>
    %cst_73 = arith.constant dense<0.000000e+00> : vector<16x32xf32>
    %167 = tpu.matmul %157, %166, %cst_73 {dimension_numbers = #tpu.dot_dimension_numbers<[1], [0], [0], [1], [0, 0, 1, 1], [], []>} : vector<16x32xbf16>, vector<32x32xbf16>, vector<16x32xf32> -> vector<16x32xf32>
    %c1_74 = arith.constant 1 : index
    %c0_75 = arith.constant 0 : index
    %c0_76 = arith.constant 0 : index
    %168 = vector.load %arg5[%c1_74, %c0_75, %c0_76] : memref<2x1x32xf32, #tpu.memory_space<vmem>>, vector<1x1x32xf32>
    %169 = vector.shape_cast %168 : vector<1x1x32xf32> to vector<1x32xf32>
    %170 = vector.broadcast %169 : vector<1x32xf32> to vector<16x32xf32>
    %171 = arith.addf %167, %170 : vector<16x32xf32>
    %172 = vector.extract_strided_slice %164 {offsets = [0, 0], sizes = [16, 8], strides = [1, 1]} : vector<16x64xf32> to vector<16x8xf32>
    %173 = vector.extract_strided_slice %164 {offsets = [0, 8], sizes = [16, 8], strides = [1, 1]} : vector<16x64xf32> to vector<16x8xf32>
    %174 = vector.extract_strided_slice %164 {offsets = [0, 16], sizes = [16, 8], strides = [1, 1]} : vector<16x64xf32> to vector<16x8xf32>
    %175 = vector.extract_strided_slice %164 {offsets = [0, 24], sizes = [16, 8], strides = [1, 1]} : vector<16x64xf32> to vector<16x8xf32>
    %176 = vector.shape_cast %172 : vector<16x8xf32> to vector<1x16x8xf32>
    %177 = vector.shape_cast %173 : vector<16x8xf32> to vector<1x16x8xf32>
    %178 = vector.shape_cast %174 : vector<16x8xf32> to vector<1x16x8xf32>
    %179 = vector.shape_cast %175 : vector<16x8xf32> to vector<1x16x8xf32>
    %180 = tpu.concatenate %176, %177, %178, %179 in 0 : vector<1x16x8xf32>, vector<1x16x8xf32>, vector<1x16x8xf32>, vector<1x16x8xf32> -> vector<4x16x8xf32>
    %181 = vector.shape_cast %180 : vector<4x16x8xf32> to vector<8x8x8xf32>
    %182 = arith.truncf %181 : vector<8x8x8xf32> to vector<8x8x8xbf16>
    %183 = vector.extract_strided_slice %164 {offsets = [0, 32], sizes = [16, 8], strides = [1, 1]} : vector<16x64xf32> to vector<16x8xf32>
    %184 = vector.extract_strided_slice %164 {offsets = [0, 40], sizes = [16, 8], strides = [1, 1]} : vector<16x64xf32> to vector<16x8xf32>
    %185 = vector.extract_strided_slice %164 {offsets = [0, 48], sizes = [16, 8], strides = [1, 1]} : vector<16x64xf32> to vector<16x8xf32>
    %186 = vector.extract_strided_slice %164 {offsets = [0, 56], sizes = [16, 8], strides = [1, 1]} : vector<16x64xf32> to vector<16x8xf32>
    %187 = vector.shape_cast %183 : vector<16x8xf32> to vector<1x16x8xf32>
    %188 = vector.shape_cast %184 : vector<16x8xf32> to vector<1x16x8xf32>
    %189 = vector.shape_cast %185 : vector<16x8xf32> to vector<1x16x8xf32>
    %190 = vector.shape_cast %186 : vector<16x8xf32> to vector<1x16x8xf32>
    %191 = tpu.concatenate %187, %188, %189, %190 in 0 : vector<1x16x8xf32>, vector<1x16x8xf32>, vector<1x16x8xf32>, vector<1x16x8xf32> -> vector<4x16x8xf32>
    %192 = vector.shape_cast %191 : vector<4x16x8xf32> to vector<8x8x8xf32>
    %193 = arith.truncf %192 : vector<8x8x8xf32> to vector<8x8x8xbf16>
    %194 = vector.extract_strided_slice %171 {offsets = [0, 0], sizes = [16, 8], strides = [1, 1]} : vector<16x32xf32> to vector<16x8xf32>
    %195 = vector.extract_strided_slice %171 {offsets = [0, 8], sizes = [16, 8], strides = [1, 1]} : vector<16x32xf32> to vector<16x8xf32>
    %196 = vector.extract_strided_slice %171 {offsets = [0, 16], sizes = [16, 8], strides = [1, 1]} : vector<16x32xf32> to vector<16x8xf32>
    %197 = vector.extract_strided_slice %171 {offsets = [0, 24], sizes = [16, 8], strides = [1, 1]} : vector<16x32xf32> to vector<16x8xf32>
    %198 = vector.shape_cast %194 : vector<16x8xf32> to vector<1x16x8xf32>
    %199 = vector.shape_cast %195 : vector<16x8xf32> to vector<1x16x8xf32>
    %200 = vector.shape_cast %196 : vector<16x8xf32> to vector<1x16x8xf32>
    %201 = vector.shape_cast %197 : vector<16x8xf32> to vector<1x16x8xf32>
    %202 = tpu.concatenate %198, %199, %200, %201 in 0 : vector<1x16x8xf32>, vector<1x16x8xf32>, vector<1x16x8xf32>, vector<1x16x8xf32> -> vector<4x16x8xf32>
    %203 = vector.shape_cast %202 : vector<4x16x8xf32> to vector<8x8x8xf32>
    %204 = arith.truncf %203 : vector<8x8x8xf32> to vector<8x8x8xbf16>
    "tpu.trace_start"() <{level = 10 : i32, message = "nqd,nkd->nqk"}> : () -> ()
    %cst_77 = arith.constant dense<0.000000e+00> : vector<8x8x8xf32>
    %205 = tpu.matmul %182, %193, %cst_77 {dimension_numbers = #tpu.dot_dimension_numbers<[2], [2], [1], [1], [0, 0, 0, 1, 1, 1], [0], [0]>} : vector<8x8x8xbf16>, vector<8x8x8xbf16>, vector<8x8x8xf32> -> vector<8x8x8xf32>
    "tpu.trace_stop"() : () -> ()
    %cst_78 = arith.constant dense<0xFF800000> : vector<8x8xf32>
    %206 = vector.multi_reduction <maximumf>, %205, %cst_78 [2] : vector<8x8x8xf32> to vector<8x8xf32>
    %207 = vector.shape_cast %206 : vector<8x8xf32> to vector<8x8x1xf32>
    %208 = vector.broadcast %207 : vector<8x8x1xf32> to vector<8x8x8xf32>
    %209 = arith.subf %205, %208 : vector<8x8x8xf32>
    %210 = math.exp %209 : vector<8x8x8xf32>
    %cst_79 = arith.constant dense<0.000000e+00> : vector<8x8xf32>
    %211 = vector.multi_reduction <add>, %210, %cst_79 [2] : vector<8x8x8xf32> to vector<8x8xf32>
    %212 = vector.shape_cast %211 : vector<8x8xf32> to vector<8x8x1xf32>
    %213 = tpu.reciprocal %212 {approx = true} : vector<8x8x1xf32> -> vector<8x8x1xf32>
    %214 = vector.broadcast %213 : vector<8x8x1xf32> to vector<8x8x8xf32>
    %215 = arith.mulf %210, %214 : vector<8x8x8xf32>
    %216 = arith.truncf %215 : vector<8x8x8xf32> to vector<8x8x8xbf16>
    "tpu.trace_start"() <{level = 10 : i32, message = "nqk,nkd->nqd"}> : () -> ()
    %cst_80 = arith.constant dense<0.000000e+00> : vector<8x8x8xf32>
    %217 = tpu.matmul %216, %204, %cst_80 {dimension_numbers = #tpu.dot_dimension_numbers<[2], [1], [1], [2], [0, 0, 0, 1, 1, 2], [0], [0]>} : vector<8x8x8xbf16>, vector<8x8x8xbf16>, vector<8x8x8xf32> -> vector<8x8x8xf32>
    "tpu.trace_stop"() : () -> ()
    %218 = vector.shape_cast %217 : vector<8x8x8xf32> to vector<4x16x8xf32>
    %219 = vector.extract_strided_slice %218 {offsets = [0, 0, 0], sizes = [1, 16, 8], strides = [1, 1, 1]} : vector<4x16x8xf32> to vector<1x16x8xf32>
    %220 = vector.shape_cast %219 : vector<1x16x8xf32> to vector<16x8xf32>
    %221 = vector.extract_strided_slice %218 {offsets = [1, 0, 0], sizes = [1, 16, 8], strides = [1, 1, 1]} : vector<4x16x8xf32> to vector<1x16x8xf32>
    %222 = vector.shape_cast %221 : vector<1x16x8xf32> to vector<16x8xf32>
    %223 = vector.extract_strided_slice %218 {offsets = [2, 0, 0], sizes = [1, 16, 8], strides = [1, 1, 1]} : vector<4x16x8xf32> to vector<1x16x8xf32>
    %224 = vector.shape_cast %223 : vector<1x16x8xf32> to vector<16x8xf32>
    %225 = vector.extract_strided_slice %218 {offsets = [3, 0, 0], sizes = [1, 16, 8], strides = [1, 1, 1]} : vector<4x16x8xf32> to vector<1x16x8xf32>
    %226 = vector.shape_cast %225 : vector<1x16x8xf32> to vector<16x8xf32>
    %227 = tpu.concatenate %220, %222, %224, %226 in 1 : vector<16x8xf32>, vector<16x8xf32>, vector<16x8xf32>, vector<16x8xf32> -> vector<16x32xf32>
    %228 = arith.truncf %227 : vector<16x32xf32> to vector<16x32xbf16>
    %c1_81 = arith.constant 1 : index
    %c0_82 = arith.constant 0 : index
    %c0_83 = arith.constant 0 : index
    %229 = vector.load %arg6[%c1_81, %c0_82, %c0_83] : memref<2x32x32xbf16, #tpu.memory_space<vmem>>, vector<1x32x32xbf16>
    %230 = vector.shape_cast %229 : vector<1x32x32xbf16> to vector<32x32xbf16>
    %cst_84 = arith.constant dense<0.000000e+00> : vector<16x32xf32>
    %231 = tpu.matmul %228, %230, %cst_84 {dimension_numbers = #tpu.dot_dimension_numbers<[1], [0], [0], [1], [0, 0, 1, 1], [], []>} : vector<16x32xbf16>, vector<32x32xbf16>, vector<16x32xf32> -> vector<16x32xf32>
    %c1_85 = arith.constant 1 : index
    %c0_86 = arith.constant 0 : index
    %c0_87 = arith.constant 0 : index
    %232 = vector.load %arg7[%c1_85, %c0_86, %c0_87] : memref<2x1x32xf32, #tpu.memory_space<vmem>>, vector<1x1x32xf32>
    %233 = vector.shape_cast %232 : vector<1x1x32xf32> to vector<1x32xf32>
    %234 = vector.broadcast %233 : vector<1x32xf32> to vector<16x32xf32>
    %235 = arith.addf %231, %234 : vector<16x32xf32>
    %236 = arith.addf %154, %235 : vector<16x32xf32>
    %c1_88 = arith.constant 1 : index
    %c0_89 = arith.constant 0 : index
    %c0_90 = arith.constant 0 : index
    %237 = vector.load %arg12[%c1_88, %c0_89, %c0_90] : memref<2x1x32xf32, #tpu.memory_space<vmem>>, vector<1x1x32xf32>
    %238 = vector.shape_cast %237 : vector<1x1x32xf32> to vector<1x32xf32>
    %c1_91 = arith.constant 1 : index
    %c0_92 = arith.constant 0 : index
    %c0_93 = arith.constant 0 : index
    %239 = vector.load %arg13[%c1_91, %c0_92, %c0_93] : memref<2x1x32xf32, #tpu.memory_space<vmem>>, vector<1x1x32xf32>
    %240 = vector.shape_cast %239 : vector<1x1x32xf32> to vector<1x32xf32>
    %cst_94 = arith.constant dense<0.000000e+00> : vector<16xf32>
    %241 = vector.multi_reduction <add>, %236, %cst_94 [1] : vector<16x32xf32> to vector<16xf32>
    %242 = vector.shape_cast %241 : vector<16xf32> to vector<16x1xf32>
    %cst_95 = arith.constant 3.200000e+01 : f32
    %243 = vector.broadcast %cst_95 : f32 to vector<16x1xf32>
    %244 = arith.divf %242, %243 : vector<16x1xf32>
    %245 = vector.broadcast %244 : vector<16x1xf32> to vector<16x32xf32>
    %246 = arith.subf %236, %245 : vector<16x32xf32>
    %247 = arith.mulf %246, %246 : vector<16x32xf32>
    %cst_96 = arith.constant dense<0.000000e+00> : vector<16xf32>
    %248 = vector.multi_reduction <add>, %247, %cst_96 [1] : vector<16x32xf32> to vector<16xf32>
    %249 = vector.shape_cast %248 : vector<16xf32> to vector<16x1xf32>
    %cst_97 = arith.constant 3.200000e+01 : f32
    %250 = vector.broadcast %cst_97 : f32 to vector<16x1xf32>
    %251 = arith.divf %249, %250 : vector<16x1xf32>
    %252 = vector.broadcast %244 : vector<16x1xf32> to vector<16x32xf32>
    %253 = arith.subf %236, %252 : vector<16x32xf32>
    %cst_98 = arith.constant 9.99999974E-6 : f32
    %254 = vector.broadcast %cst_98 : f32 to vector<16x1xf32>
    %255 = arith.addf %251, %254 : vector<16x1xf32>
    %256 = math.rsqrt %255 : vector<16x1xf32>
    %257 = vector.broadcast %256 : vector<16x1xf32> to vector<16x32xf32>
    %258 = arith.mulf %253, %257 : vector<16x32xf32>
    %259 = vector.broadcast %238 : vector<1x32xf32> to vector<16x32xf32>
    %260 = arith.mulf %258, %259 : vector<16x32xf32>
    %261 = vector.broadcast %240 : vector<1x32xf32> to vector<16x32xf32>
    %262 = arith.addf %260, %261 : vector<16x32xf32>
    %263 = arith.truncf %262 : vector<16x32xf32> to vector<16x32xbf16>
    %c1_99 = arith.constant 1 : index
    %c0_100 = arith.constant 0 : index
    %c0_101 = arith.constant 0 : index
    %264 = vector.load %arg8[%c1_99, %c0_100, %c0_101] : memref<2x32x64xbf16, #tpu.memory_space<vmem>>, vector<1x32x64xbf16>
    %265 = vector.shape_cast %264 : vector<1x32x64xbf16> to vector<32x64xbf16>
    %cst_102 = arith.constant dense<0.000000e+00> : vector<16x64xf32>
    %266 = tpu.matmul %263, %265, %cst_102 {dimension_numbers = #tpu.dot_dimension_numbers<[1], [0], [0], [1], [0, 0, 1, 1], [], []>} : vector<16x32xbf16>, vector<32x64xbf16>, vector<16x64xf32> -> vector<16x64xf32>
    %c1_103 = arith.constant 1 : index
    %c0_104 = arith.constant 0 : index
    %c0_105 = arith.constant 0 : index
    %267 = vector.load %arg9[%c1_103, %c0_104, %c0_105] : memref<2x1x64xf32, #tpu.memory_space<vmem>>, vector<1x1x64xf32>
    %268 = vector.shape_cast %267 : vector<1x1x64xf32> to vector<1x64xf32>
    %269 = vector.broadcast %268 : vector<1x64xf32> to vector<16x64xf32>
    %270 = arith.addf %266, %269 : vector<16x64xf32>
    %cst_106 = arith.constant 0.000000e+00 : f32
    %271 = vector.broadcast %cst_106 : f32 to vector<16x64xf32>
    %272 = arith.maximumf %270, %271 : vector<16x64xf32>
    %273 = arith.truncf %272 : vector<16x64xf32> to vector<16x64xbf16>
    %c1_107 = arith.constant 1 : index
    %c0_108 = arith.constant 0 : index
    %c0_109 = arith.constant 0 : index
    %274 = vector.load %arg10[%c1_107, %c0_108, %c0_109] : memref<2x64x32xbf16, #tpu.memory_space<vmem>>, vector<1x64x32xbf16>
    %275 = vector.shape_cast %274 : vector<1x64x32xbf16> to vector<64x32xbf16>
    %cst_110 = arith.constant dense<0.000000e+00> : vector<16x32xf32>
    %276 = tpu.matmul %273, %275, %cst_110 {dimension_numbers = #tpu.dot_dimension_numbers<[1], [0], [0], [1], [0, 0, 1, 1], [], []>} : vector<16x64xbf16>, vector<64x32xbf16>, vector<16x32xf32> -> vector<16x32xf32>
    %c1_111 = arith.constant 1 : index
    %c0_112 = arith.constant 0 : index
    %c0_113 = arith.constant 0 : index
    %277 = vector.load %arg11[%c1_111, %c0_112, %c0_113] : memref<2x1x32xf32, #tpu.memory_space<vmem>>, vector<1x1x32xf32>
    %278 = vector.shape_cast %277 : vector<1x1x32xf32> to vector<1x32xf32>
    %279 = vector.broadcast %278 : vector<1x32xf32> to vector<16x32xf32>
    %280 = arith.addf %276, %279 : vector<16x32xf32>
    %281 = arith.addf %262, %280 : vector<16x32xf32>
    %c1_114 = arith.constant 1 : index
    %c0_115 = arith.constant 0 : index
    %c0_116 = arith.constant 0 : index
    %282 = vector.load %arg14[%c1_114, %c0_115, %c0_116] : memref<2x1x32xf32, #tpu.memory_space<vmem>>, vector<1x1x32xf32>
    %283 = vector.shape_cast %282 : vector<1x1x32xf32> to vector<1x32xf32>
    %c1_117 = arith.constant 1 : index
    %c0_118 = arith.constant 0 : index
    %c0_119 = arith.constant 0 : index
    %284 = vector.load %arg15[%c1_117, %c0_118, %c0_119] : memref<2x1x32xf32, #tpu.memory_space<vmem>>, vector<1x1x32xf32>
    %285 = vector.shape_cast %284 : vector<1x1x32xf32> to vector<1x32xf32>
    %cst_120 = arith.constant dense<0.000000e+00> : vector<16xf32>
    %286 = vector.multi_reduction <add>, %281, %cst_120 [1] : vector<16x32xf32> to vector<16xf32>
    %287 = vector.shape_cast %286 : vector<16xf32> to vector<16x1xf32>
    %cst_121 = arith.constant 3.200000e+01 : f32
    %288 = vector.broadcast %cst_121 : f32 to vector<16x1xf32>
    %289 = arith.divf %287, %288 : vector<16x1xf32>
    %290 = vector.broadcast %289 : vector<16x1xf32> to vector<16x32xf32>
    %291 = arith.subf %281, %290 : vector<16x32xf32>
    %292 = arith.mulf %291, %291 : vector<16x32xf32>
    %cst_122 = arith.constant dense<0.000000e+00> : vector<16xf32>
    %293 = vector.multi_reduction <add>, %292, %cst_122 [1] : vector<16x32xf32> to vector<16xf32>
    %294 = vector.shape_cast %293 : vector<16xf32> to vector<16x1xf32>
    %cst_123 = arith.constant 3.200000e+01 : f32
    %295 = vector.broadcast %cst_123 : f32 to vector<16x1xf32>
    %296 = arith.divf %294, %295 : vector<16x1xf32>
    %297 = vector.broadcast %289 : vector<16x1xf32> to vector<16x32xf32>
    %298 = arith.subf %281, %297 : vector<16x32xf32>
    %cst_124 = arith.constant 9.99999974E-6 : f32
    %299 = vector.broadcast %cst_124 : f32 to vector<16x1xf32>
    %300 = arith.addf %296, %299 : vector<16x1xf32>
    %301 = math.rsqrt %300 : vector<16x1xf32>
    %302 = vector.broadcast %301 : vector<16x1xf32> to vector<16x32xf32>
    %303 = arith.mulf %298, %302 : vector<16x32xf32>
    %304 = vector.broadcast %283 : vector<1x32xf32> to vector<16x32xf32>
    %305 = arith.mulf %303, %304 : vector<16x32xf32>
    %306 = vector.broadcast %285 : vector<1x32xf32> to vector<16x32xf32>
    %307 = arith.addf %305, %306 : vector<16x32xf32>
    %c0_125 = arith.constant 0 : index
    %c0_126 = arith.constant 0 : index
    %308 = vector.load %arg16[%c0_125, %c0_126] : memref<16x32xf32, #tpu.memory_space<vmem>>, vector<16x32xf32>
    tpu.vector_store %arg16[%c0_125, %c0_126], %307 {strides = array<i32>} : memref<16x32xf32, #tpu.memory_space<vmem>>, vector<16x32xf32>,
    return
  }
}

</mosaic_0001>

<bundles_post_ra>
// kernel: tpu_custom_call.1
= control target key start
LH: loop header
LB: loop body
LE: loop exit
PB: predicated region body
PF: predicated region fallthrough
CT: control target
= control target key end

     0   :  { %s4501_s0 = inlined_call_operand.hbm [shape: f32[16,32], index: 0, kind: input, shape index: {}]   ;;  %s4502_s1 = inlined_call_operand.hbm [shape: f32[16,32], index: 1, kind: input, shape index: {}]   ;;  %s4503_s2 = inlined_call_operand.vmem [shape: bf16[2,32,64], index: 2, kind: input, shape index: {}]   ;;  %s4504_s3 = inlined_call_operand.vmem [shape: f32[2,1,64], index: 3, kind: input, shape index: {}]   ;;  %s4505_s4 = inlined_call_operand.vmem [shape: bf16[2,32,32], index: 4, kind: input, shape index: {}]   ;;  %s4506_s5 = inlined_call_operand.vmem [shape: f32[2,1,32], index: 5, kind: input, shape index: {}]   ;;  %s4507_s6 = inlined_call_operand.vmem [shape: bf16[2,32,32], index: 6, kind: input, shape index: {}]   ;;  %s4508_s7 = inlined_call_operand.hbm [shape: f32[2,1,32], index: 7, kind: input, shape index: {}]   ;;  %s4509_s8 = inlined_call_operand.hbm [shape: bf16[2,32,64], index: 8, kind: input, shape index: {}]   ;;  %s4510_s9 = inlined_call_operand.hbm [shape: f32[2,1,64], index: 9, kind: input, shape index: {}]   ;;  %s4511_s10 = inlined_call_operand.vmem [shape: bf16[2,64,32], index: 10, kind: input, shape index: {}]   ;;  %s4512_s11 = inlined_call_operand.vmem [shape: f32[2,1,32], index: 11, kind: input, shape index: {}]   ;;  %s4513_s12 = inlined_call_operand.vmem [shape: f32[2,1,32], index: 12, kind: input, shape index: {}]   ;;  %s4514_s13 = inlined_call_operand.vmem [shape: f32[2,1,32], index: 13, kind: input, shape index: {}]   ;;  %s4515_s14 = inlined_call_operand.vmem [shape: f32[2,1,32], index: 14, kind: input, shape index: {}]   ;;  %s4516_s15 = inlined_call_operand.vmem [shape: f32[2,1,32], index: 15, kind: input, shape index: {}]   ;;  %s4517_s16 = inlined_call_operand.hbm [shape: f32[16,32], index: 16, kind: output, shape index: {}]  }
   0x1   :  { %4524 = sst [smem:[#allocation16_spill]] %s4501_s0 }
   0x2   :  { %4525 = sst [smem:[#allocation17_spill]] %s4517_s16 }
   0x3   :  { %21 = vsyncpa [#allocation3], 0 }
   0x4   :  { %22 = vsyncpa [#allocation6], 0 }
   0x5   :  { %23 = vsyncpa [#allocation9], 0 }
   0x6   :  { %24 = vsyncpa [#allocation4], 0  ;;  %s3801_s21 = smov [#allocation5]   ;;  %s3802_s23 = smov [#allocation8]  }
   0x7   :  { %s42_s22 = sshll.u32 %s3801_s21, 4  ;;  %s76_s24 = sshll.u32 %s3802_s23, 4  ;;  %s43_s22 = int_to_ptr.vmem [resolvable:$true] %s42_s22  ;;  %s3905_s24 = int_to_ptr.vmem [resolvable:$true] %s76_s24 }
   0x8   :  { %s3661_s27 = scalar_lea.hbm %s4502_s1, 256 }
   0x9   :  { %p3662_p0 = scmp.ne.s32.totalorder %s4502_s1, %s3661_s27  ;;  %p3665_p1 = scmp.lt.u32.totalorder %s3661_s27, %s4502_s1 }
   0xb   :  { %p3667_p2 = pnand %p3665_p1, %p3662_p0 }
   0xd   :  { %3670 = shalt.err (!%p3667_p2)
}
   0xe   :  { %s3671_s17 = scalar_lea.vmem %s43_s22, 256  ;;  %p3676_p4 = scmp.lt.s32.totalorder %s43_s22, %s43_s22 }
   0xf   :  { %p3672_p3 = scmp.ne.s32.totalorder %s43_s22, %s3671_s17  ;;  %p3677_p5 = scmp.lt.s32.totalorder %s3671_s17, %s3671_s17 }
  0x11   :  { %p3678_p6 = por %p3677_p5, %p3676_p4 }
  0x13   :  { %p3679_p7 = pnand %p3678_p6, %p3672_p3 }
  0x15   :  { %3682 = shalt.err (!%p3679_p7)
}
  0x16   :  { %s4519_s18 = smov 128   ;;  %s4521_s19 = smov 8  }
  0x17   :  { %48 = dma.hbm_to_vmem [thread:$0]  %s4502_s1, 256, %s43_s22, [#allocation6], %s4519_s18, %s4519_s18, %s4521_s19  }
  0x18   :  { %s3683_s26 = scalar_lea.hbm %s4509_s8, 512 }
  0x19   :  { %p3684_p8 = scmp.ne.s32.totalorder %s4509_s8, %s3683_s26  ;;  %p3687_p9 = scmp.lt.u32.totalorder %s3683_s26, %s4509_s8 }
  0x1b   :  { %p3689_p10 = pnand %p3687_p9, %p3684_p8 }
  0x1d   :  { %3692 = shalt.err (!%p3689_p10)
}
  0x1e   :  { %s3693_s0 = scalar_lea.vmem %s3905_s24, 512  ;;  %p3698_p12 = scmp.lt.s32.totalorder %s3905_s24, %s3905_s24 }
  0x1f   :  { %p3694_p11 = scmp.ne.s32.totalorder %s3905_s24, %s3693_s0  ;;  %p3699_p13 = scmp.lt.s32.totalorder %s3693_s0, %s3693_s0 }
  0x21   :  { %p3700_p0 = por %p3699_p13, %p3698_p12 }
  0x23   :  { %p3701_p1 = pnand %p3700_p0, %p3694_p11 }
  0x25   :  { %3704 = shalt.err (!%p3701_p1)
}
  0x26   :  { %s3805_s1 = smov 64   ;;  %s3806_s22 = smov 4  }
  0x27   :  { %82 = dma.hbm_to_vmem [thread:$0]  %s4509_s8, 512, %s3905_s24, [#allocation9], %s3805_s1, %s3805_s1, %s3806_s22  }
  0x28   :  { %s3807_s21 = smov [#allocation2]   ;;  %s3808_s25 = smov [#allocation7]  }
  0x29   :  { %s30_s23 = sshll.u32 %s3807_s21, 4  ;;  %s64_s26 = sshll.u32 %s3808_s25, 4  ;;  %s31_s23 = int_to_ptr.vmem [resolvable:$true] %s30_s23  ;;  %s3939_s26 = int_to_ptr.vmem [resolvable:$true] %s64_s26 }
  0x2a   :  { %s4526_s29 = sld [smem:[#allocation16_spill]] }
  0x30   :  { %s3705_s30 = scalar_lea.hbm %s4526_s29, 256 }
  0x31   :  { %p3706_p2 = scmp.ne.s32.totalorder %s4526_s29, %s3705_s30  ;;  %p3709_p3 = scmp.lt.u32.totalorder %s3705_s30, %s4526_s29 }
  0x33   :  { %p3711_p4 = pnand %p3709_p3, %p3706_p2 }
  0x35   :  { %3714 = shalt.err (!%p3711_p4)
}
  0x36   :  { %s3715_s8 = scalar_lea.vmem %s31_s23, 256  ;;  %p3720_p6 = scmp.lt.s32.totalorder %s31_s23, %s31_s23 }
  0x37   :  { %p3716_p5 = scmp.ne.s32.totalorder %s31_s23, %s3715_s8  ;;  %p3721_p7 = scmp.lt.s32.totalorder %s3715_s8, %s3715_s8 }
  0x39   :  { %p3722_p8 = por %p3721_p7, %p3720_p6 }
  0x3b   :  { %p3723_p9 = pnand %p3722_p8, %p3716_p5 }
  0x3d   :  { %3726 = shalt.err (!%p3723_p9)
}
  0x3e   :  { %s4527_s24 = smov 8   ;;  %s4528_s1 = smov 128  }
  0x3f   :  { %36 = dma.hbm_to_vmem [thread:$0]  %s4526_s29, 256, %s31_s23, [#allocation3], %s4528_s1, %s4528_s1, %s4527_s24  }
  0x40   :  { %s3727_s16 = scalar_lea.hbm %s4508_s7, 32 }
  0x41   :  { %p3728_p10 = scmp.ne.s32.totalorder %s4508_s7, %s3727_s16  ;;  %p3731_p11 = scmp.lt.u32.totalorder %s3727_s16, %s4508_s7 }
  0x43   :  { %p3733_p12 = pnand %p3731_p11, %p3728_p10 }
  0x45   :  { %3736 = shalt.err (!%p3733_p12)
}
  0x46   :  { %s3737_s28 = scalar_lea.vmem %s3939_s26, 32  ;;  %p3742_p0 = scmp.lt.s32.totalorder %s3939_s26, %s3939_s26 }
  0x47   :  { %p3738_p13 = scmp.ne.s32.totalorder %s3939_s26, %s3737_s28  ;;  %p3743_p1 = scmp.lt.s32.totalorder %s3737_s28, %s3737_s28 }
  0x49   :  { %p3744_p2 = por %p3743_p1, %p3742_p0 }
  0x4b   :  { %p3745_p3 = pnand %p3744_p2, %p3738_p13 }
  0x4d   :  { %3748 = shalt.err (!%p3745_p3)
}
  0x4e   :  { %s3809_s23 = smov 16   ;;  %s3810_s29 = smov 1  }
  0x4f   :  { %70 = dma.hbm_to_vmem [thread:$0]  %s4508_s7, 32, %s3939_s26, [#allocation6], %s3809_s23, %s3809_s23, %s3810_s29  }
  0x50   :  { %s3811_s8 = smov [#allocation10]   ;;  %s3749_s20 = scalar_lea.hbm %s4510_s9, 32 }
  0x51   :  { %s88_s22 = sshll.u32 %s3811_s8, 4  ;;  %p3750_p4 = scmp.ne.s32.totalorder %s4510_s9, %s3749_s20  ;;  %s89_s22 = int_to_ptr.vmem [resolvable:$true] %s88_s22 }
  0x52   :  { %p3753_p5 = scmp.lt.u32.totalorder %s3749_s20, %s4510_s9 }
  0x54   :  { %p3755_p6 = pnand %p3753_p5, %p3750_p4 }
  0x56   :  { %3758 = shalt.err (!%p3755_p6)
}
  0x57   :  { %s3759_s27 = scalar_lea.vmem %s89_s22, 32  ;;  %p3764_p8 = scmp.lt.s32.totalorder %s89_s22, %s89_s22 }
  0x58   :  { %p3760_p7 = scmp.ne.s32.totalorder %s89_s22, %s3759_s27  ;;  %p3765_p9 = scmp.lt.s32.totalorder %s3759_s27, %s3759_s27 }
  0x5a   :  { %p3766_p10 = por %p3765_p9, %p3764_p8 }
  0x5c   :  { %p3767_p11 = pnand %p3766_p10, %p3760_p7 }
  0x5e   :  { %3770 = shalt.err (!%p3767_p11)
}
  0x5f   :  { %94 = dma.hbm_to_vmem [thread:$0]  %s4510_s9, 32, %s89_s22, [#allocation9], %s3809_s23, %s3809_s23, %s3810_s29  }
  0x60   :  { %3793 = dma.done.wait [#allocation3], 256  }
  0x61   :  { %3794 = vsyncadd [#allocation3], 4294967040 }
  0x62   :  { %3795 = dma.done.wait [#allocation6], 288  }
  0x63   :  { %3796 = vsyncadd [#allocation6], 4294967008 }
  0x64   :  { %3797 = dma.done.wait [#allocation9], 544  }
  0x65   :  { %3798 = vsyncadd [#allocation9], 4294966752  ;;  %v3812_v0 = vmov 0.0   ;;  %vm3813_vm0 = vmmov 0   ;;  %v3555_v1 = vld [vmem:[%s4503_s2] sm:$0xff]   ;;  %v3556_v2 = vld [vmem:[%s4503_s2 + $0x8] sm:$0xff]  }
  0x66   :  { %3166 = vmatprep.subr.bf16.mxu1 %v3812_v0  ;;  %3170 = vmatprep.mubr.msk.bf16.mxu1 %vm3813_vm0, %v3812_v0  ;;  %v4001_v3 = vld [vmem:[#allocation2] sm:$0xff]  ;;  %v4003_v4 = vld [vmem:[#allocation2 + $0x8] sm:$0xff]  ;;  %v125_v5 = vld [vmem:[#allocation5] sm:$0xff]  ;;  %vm154_vm1 = vcmask 261120   ;;  %s3814_s16 = smov 104   ;;  %s3815_s19 = smov 120  }
  0x67   :  { %3182 = vmatprep.subr.bf16.mxu0 %v3812_v0  ;;  %3184 = vmatprep.mubr.msk.bf16.mxu0 %vm3813_vm0, %v3812_v0  ;;  %v126_v6 = vld [vmem:[#allocation5 + $0x8] sm:$0xff]  ;;  %v127_v7 = vadd.f32 %v125_v5, %v4001_v3  ;;  %v3557_v10 = vld [vmem:[%s4505_s4] sm:$0xff]   ;;  %v3558_v11 = vld [vmem:[%s4505_s4 + $0x8] sm:$0xff]   ;;  %v130_v14 = vpack.c.bf16 %v4003_v4, %v4001_v3  ;;  %s3816_s21 = smov 96   ;;  %s3817_s25 = smov 112   ;;  %vm325_vm2 = vcmask 64512  }
  0x68   :  { %3167 = vmatpush3.bf16.msra.mxu1 %v3555_v1  ;;  %v128_v8 = vadd.f32 %v126_v6, %v4003_v4  ;;  %v2957_v12 = vld [vmem:[%s4504_s3] ss:$0 sm:$0xff]  ;;  %vm814_vm3 = vcmask 1043456   ;;  %s3818_s30 = smov 24   ;;  %vm1206_vm4 = vcmask 130048   ;;  %vm1209_vm5 = vcmask 195584  }
  0x69   :  { %3168 = vmatprep.subr.bf16.mxu1 %v3812_v0  ;;  %v2961_v54 = vld [vmem:[%s4506_s5] ss:$0 sm:$0xff]  ;;  %vm1437_vm6 = vcmask 523264   ;;  %s3819_s0 = smov [#allocation11]  }
  0x6a   :  { %v129_v9 = vpack.c.bf16 %v128_v8, %v127_v7  ;;  %s2943_s8 = sshll.u32 %s3819_s0, 4  ;;  %s2944_s8 = int_to_ptr.vmem [resolvable:$true] %s2943_s8 }
  0x6b   :  { %s3771_s22 = scalar_lea.vmem %s2944_s8, 256  ;;  %p3776_p13 = scmp.lt.s32.totalorder %s2944_s8, %s2944_s8 }
  0x6c   :  { %3169 = vmatpush3.bf16.msra.mxu1 %v3556_v2  ;;  %p3772_p12 = scmp.ne.s32.totalorder %s2944_s8, %s3771_s22  ;;  %p3777_p0 = scmp.lt.s32.totalorder %s3771_s22, %s3771_s22 }
  0x6d   :  { %3174 = vmatprep.subr.bf16.mxu1 %v3812_v0 }
  0x6e   :  { %p3778_p1 = por %p3777_p0, %p3776_p13 }
  0x6f   :  { %3171 = vmatmul.mubr.msk.bf16.vlgmr.msra.gmra.mrb[0].mxu1 %vm154_vm1, %v129_v9 }
  0x70   :  { %3178 = vmatprep.mubr.msk.bf16.mxu1 %vm3813_vm0, %v3812_v0  ;;  %3175 = vmatpush3.bf16.msra.mxu1 %v3557_v10  ;;  %p3779_p2 = pnand %p3778_p1, %p3772_p12 }
  0x71   :  { %3176 = vmatprep.subr.bf16.mxu1 %v3812_v0 }
  0x74   :  { %3177 = vmatpush3.bf16.msra.mxu1 %v3558_v11 }
  0x75   :  { %3188 = vmatprep.subr.bf16.mxu1 %v3812_v0 }
  0x77   :  { %3179 = vmatmul.mubr.msk.bf16.vlgmr.msra.gmra.mrb[4].mxu1 %vm154_vm1, %v130_v14 }
  0x78   :  { %3190 = vmatprep.mubr.msk.bf16.mxu1 %vm3813_vm0, %v3812_v0 }
 0x142   :  { %v192_v13 = vpop.f32.mrb[0].mxu1 }
 0x143   :  { %v3172_v15 = vpop.f32.mrb[1].mxu1  ;;  %v193_v17 = vadd.f32 %v2957_v12, %v192_v13 }
 0x144   :  { %v195_v16 = vpop.f32.mrb[2].mxu1 }
 0x145   :  { %v196_v18 = vadd.f32 %v2957_v12, %v195_v16  ;;  %v3173_v19 = vpop.f32.mrb[3].mxu1  ;;  %v286_v21 = vpack.c.bf16 %v193_v17, %v193_v17 }
 0x147   :  { %v3475_v20 = vpack.i.bf16 %v196_v18, %v193_v17  ;;  %v287_v22 = vpack.c.bf16 %v196_v18, %v196_v18 }
 0x149   :  { %3476 = vrot.lane.b32.xlu1 %v3475_v20, %s3814_s16  ;;  %3466 = vrot.lane.b32.xlu0 %v3475_v20, %s3815_s19 }
 0x14a   :  { %v259_v42 = vpop.f32.mrb[4].mxu1 }
 0x14b   :  { %v3180_v43 = vpop.f32.mrb[5].mxu1  ;;  %v4066_v57 = vadd.f32 %v2961_v54, %v259_v42 }
 0x14c   :  { %v262_v44 = vpop.f32.mrb[6].mxu1 }
 0x14d   :  { %323 = vrot.lane.b32.xlu1 %v286_v21, %s3816_s21  ;;  %3471 = vrot.lane.b32.xlu0 %v3475_v20, %s3817_s25  ;;  %v3181_v45 = vpop.f32.mrb[7].mxu1  ;;  %v4068_v58 = vadd.f32 %v2961_v54, %v262_v44  ;;  %v314_v61 = vpack.c.bf16 %v4066_v57, %v4066_v57 }
 0x14f   :  { %v315_v62 = vpack.c.bf16 %v4068_v58, %v4068_v58  ;;  %v816_v63 = vsel %vm814_vm3, %v314_v61, 0 }
 0x151   :  { %373 = vrot.lane.b32.xlu0 %v287_v22, %s3816_s21  ;;  %v862_v1 = vsel %vm814_vm3, %v315_v62, 0 }
 0x1bb   :  { %v3477_v23 = vpop.permute.xlu1 %3476  ;;  %v3467_v24 = vpop.permute.xlu0 %3466 }
 0x1bc   :  { %v3469_v25 = vunpack.i.h.bf16 %v3467_v24  ;;  %v3468_v26 = vunpack.i.l.bf16 %v3467_v24  ;;  %v3478_v34 = vunpack.i.l.bf16 %v3477_v23  ;;  %v3479_v37 = vunpack.i.h.bf16 %v3477_v23 }
 0x1be   :  { %v289_v27 = vpack.c.bf16 %v3469_v25, %v3469_v25  ;;  %v288_v28 = vpack.c.bf16 %v3468_v26, %v3468_v26  ;;  %v292_v40 = vpack.c.bf16 %v3478_v34, %v3478_v34  ;;  %v293_v41 = vpack.c.bf16 %v3479_v37, %v3479_v37 }
 0x1bf   :  { %v324_v29 = vpop.permute.xlu1 %323  ;;  %v3472_v30 = vpop.permute.xlu0 %3471 }
 0x1c0   :  { %v3474_v31 = vunpack.i.h.bf16 %v3472_v30  ;;  %v3473_v32 = vunpack.i.l.bf16 %v3472_v30  ;;  %422 = vrot.lane.b32.xlu1 %v288_v28, %s3816_s21  ;;  %471 = vrot.lane.b32.xlu0 %v289_v27, %s3816_s21  ;;  %v330_v33 = vsel %vm325_vm2, %v324_v29, 0 }
 0x1c1   :  { %3183 = vmatpush3.bf16.xpose.msra.mxu0 %v330_v33 }
 0x1c2   :  { %v291_v35 = vpack.c.bf16 %v3474_v31, %v3474_v31  ;;  %v290_v36 = vpack.c.bf16 %v3473_v32, %v3473_v32  ;;  %3194 = vmatprep.subr.bf16.mxu0 %v3812_v0 }
 0x1c3   :  { %v374_v38 = vpop.permute.xlu0 %373 }
 0x1c4   :  { %v379_v39 = vsel %vm325_vm2, %v374_v38, 0  ;;  %520 = vrot.lane.b32.xlu1 %v290_v36, %s3816_s21  ;;  %569 = vrot.lane.b32.xlu0 %v291_v35, %s3816_s21 }
 0x1c5   :  { %3189 = vmatpush3.bf16.xpose.msra.mxu1 %v379_v39 }
 0x1c6   :  { %3200 = vmatprep.subr.bf16.mxu1 %v3812_v0 }
 0x1c8   :  { %3185 = vmatmul.mubr.msk.bf16.vlgmr.msra.gmra.mrb[0].mxu0 %vm325_vm2, %v286_v21  ;;  %618 = vrot.lane.b32.xlu1 %v292_v40, %s3816_s21 }
 0x1c9   :  { %667 = vrot.lane.b32.xlu0 %v293_v41, %s3816_s21  ;;  %3196 = vmatprep.mubr.msk.bf16.mxu0 %vm3813_vm0, %v3812_v0 }
 0x1cc   :  { %3191 = vmatmul.mubr.msk.bf16.vlgmr.msra.gmra.mrb[8].mxu1 %vm325_vm2, %v287_v22 }
 0x1cd   :  { %3202 = vmatprep.mubr.msk.bf16.mxu1 %vm3813_vm0, %v3812_v0 }
 0x232   :  { %v423_v46 = vpop.permute.xlu1 %422  ;;  %v472_v47 = vpop.permute.xlu0 %471 }
 0x233   :  { %v428_v48 = vsel %vm325_vm2, %v423_v46, 0  ;;  %v477_v49 = vsel %vm325_vm2, %v472_v47, 0 }
 0x234   :  { %3195 = vmatpush3.bf16.xpose.msra.mxu0 %v428_v48  ;;  %3201 = vmatpush3.bf16.xpose.msra.mxu1 %v477_v49 }
 0x235   :  { %3206 = vmatprep.subr.bf16.mxu0 %v3812_v0  ;;  %3212 = vmatprep.subr.bf16.mxu1 %v3812_v0 }
 0x236   :  { %v521_v50 = vpop.permute.xlu1 %520  ;;  %v570_v51 = vpop.permute.xlu0 %569 }
 0x237   :  { %v526_v52 = vsel %vm325_vm2, %v521_v50, 0  ;;  %v575_v53 = vsel %vm325_vm2, %v570_v51, 0 }
 0x23a   :  { %v619_v55 = vpop.permute.xlu1 %618 }
 0x23b   :  { %3197 = vmatmul.mubr.msk.bf16.vlgmr.msra.gmra.mrb[4].mxu0 %vm325_vm2, %v288_v28  ;;  %3203 = vmatmul.mubr.msk.bf16.vlgmr.msra.gmra.mrb[12].mxu1 %vm325_vm2, %v289_v27  ;;  %v668_v56 = vpop.permute.xlu0 %667  ;;  %v624_v59 = vsel %vm325_vm2, %v619_v55, 0 }
 0x23c   :  { %3207 = vmatpush3.bf16.xpose.msra.mxu0 %v526_v52  ;;  %3213 = vmatpush3.bf16.xpose.msra.mxu1 %v575_v53  ;;  %v673_v60 = vsel %vm325_vm2, %v668_v56, 0 }
 0x23d   :  { %3208 = vmatprep.mubr.msk.bf16.mxu0 %vm3813_vm0, %v3812_v0  ;;  %3214 = vmatprep.mubr.msk.bf16.mxu1 %vm3813_vm0, %v3812_v0 }
 0x23e   :  { %3218 = vmatprep.subr.bf16.mxu0 %v3812_v0  ;;  %3224 = vmatprep.subr.bf16.mxu1 %v3812_v0 }
 0x243   :  { %3209 = vmatmul.mubr.msk.bf16.vlgmr.msra.gmra.mrb[8].mxu0 %vm325_vm2, %v290_v36  ;;  %3215 = vmatmul.mubr.msk.bf16.vlgmr.msra.gmra.mrb[16].mxu1 %vm325_vm2, %v291_v35 }
 0x244   :  { %3219 = vmatpush3.bf16.xpose.msra.mxu0 %v624_v59  ;;  %3225 = vmatpush3.bf16.xpose.msra.mxu1 %v673_v60 }
 0x245   :  { %3220 = vmatprep.mubr.msk.bf16.mxu0 %vm3813_vm0, %v3812_v0  ;;  %3226 = vmatprep.mubr.msk.bf16.mxu1 %vm3813_vm0, %v3812_v0 }
 0x246   :  { %3230 = vmatprep.subr.bf16.mxu0 %v3812_v0  ;;  %3236 = vmatprep.subr.bf16.mxu1 %v3812_v0 }
 0x24b   :  { %3221 = vmatmul.mubr.msk.bf16.vlgmr.msra.gmra.mrb[12].mxu0 %vm325_vm2, %v292_v40  ;;  %3227 = vmatmul.mubr.msk.bf16.vlgmr.msra.gmra.mrb[20].mxu1 %vm325_vm2, %v293_v41 }
 0x24c   :  { %3231 = vmatpush3.bf16.msra.mxu0 %v816_v63  ;;  %3237 = vmatpush3.bf16.msra.mxu1 %v862_v1 }
 0x24d   :  { %3232 = vmatprep.mubr.msk.bf16.mxu0 %vm3813_vm0, %v3812_v0  ;;  %3238 = vmatprep.mubr.msk.bf16.mxu1 %vm3813_vm0, %v3812_v0 }
 0x24e   :  { %3242 = vmatprep.subr.bf16.mxu0 %v3812_v0  ;;  %3248 = vmatprep.subr.bf16.mxu1 %v3812_v0 }
 0x29b   :  { %v366_v2 = vpop.f32.mrb[0].mxu0 }
 0x29c   :  { %v3186_v5 = vpop.f32.mrb[1].mxu0  ;;  %v715_v6 = vsel %vm325_vm2, %v366_v2, -inf }
 0x29d   :  { %v369_v7 = vpop.f32.mrb[2].mxu0  ;;  %716 = vmax.xlane.f32.xlu1 %v715_v6 }
 0x29e   :  { %v3187_v8 = vpop.f32.mrb[3].mxu0 }
 0x29f   :  { %v415_v9 = vpop.f32.mrb[8].mxu1 }
 0x2a0   :  { %v3192_v10 = vpop.f32.mrb[9].mxu1  ;;  %v718_v11 = vsel %vm325_vm2, %v415_v9, -inf }
 0x2a1   :  { %719 = vmax.xlane.f32.xlu0 %v718_v11  ;;  %v418_v12 = vpop.f32.mrb[10].mxu1 }
 0x2a2   :  { %v3193_v13 = vpop.f32.mrb[11].mxu1 }
 0x30e   :  { %v464_v14 = vpop.f32.mrb[4].mxu0  ;;  %v513_v15 = vpop.f32.mrb[12].mxu1 }
 0x30f   :  { %v3198_v16 = vpop.f32.mrb[5].mxu0  ;;  %v3204_v17 = vpop.f32.mrb[13].mxu1  ;;  %v721_v18 = vsel %vm325_vm2, %v464_v14, -inf  ;;  %v724_v19 = vsel %vm325_vm2, %v513_v15, -inf }
 0x310   :  { %v467_v20 = vpop.f32.mrb[6].mxu0  ;;  %722 = vmax.xlane.f32.xlu0 %v721_v18  ;;  %725 = vmax.xlane.f32.xlu1 %v724_v19  ;;  %v516_v21 = vpop.f32.mrb[14].mxu1 }
 0x311   :  { %v3199_v22 = vpop.f32.mrb[7].mxu0  ;;  %v3205_v23 = vpop.f32.mrb[15].mxu1  ;;  %v3485_v20 = vpack.i.bf16 %v4068_v58, %v4066_v57 }
 0x316   :  { %v562_v24 = vpop.f32.mrb[8].mxu0  ;;  %v611_v25 = vpop.f32.mrb[16].mxu1 }
 0x317   :  { %v3210_v26 = vpop.f32.mrb[9].mxu0  ;;  %v3216_v27 = vpop.f32.mrb[17].mxu1  ;;  %v727_v28 = vsel %vm325_vm2, %v562_v24, -inf  ;;  %v730_v29 = vsel %vm325_vm2, %v611_v25, -inf }
 0x318   :  { %v565_v30 = vpop.f32.mrb[10].mxu0  ;;  %728 = vmax.xlane.f32.xlu0 %v727_v28  ;;  %731 = vmax.xlane.f32.xlu1 %v730_v29  ;;  %v614_v31 = vpop.f32.mrb[18].mxu1 }
 0x319   :  { %v3211_v32 = vpop.f32.mrb[11].mxu0  ;;  %v3217_v33 = vpop.f32.mrb[19].mxu1 }
 0x31e   :  { %v660_v34 = vpop.f32.mrb[12].mxu0  ;;  %v4100_v35 = vpop.f32.mrb[20].mxu1 }
 0x31f   :  { %v3222_v36 = vpop.f32.mrb[13].mxu0  ;;  %v3228_v37 = vpop.f32.mrb[21].mxu1  ;;  %v733_v38 = vsel %vm325_vm2, %v660_v34, -inf  ;;  %v736_v39 = vsel %vm325_vm2, %v4100_v35, -inf }
 0x320   :  { %v663_v40 = vpop.f32.mrb[14].mxu0  ;;  %734 = vmax.xlane.f32.xlu0 %v733_v38  ;;  %737 = vmax.xlane.f32.xlu1 %v736_v39  ;;  %v712_v41 = vpop.f32.mrb[22].mxu1 }
 0x321   :  { %v3223_v42 = vpop.f32.mrb[15].mxu0  ;;  %v3229_v43 = vpop.f32.mrb[23].mxu1 }
 0x32a   :  { %v717_v44 = vpop.xlane.xlu1 %716 }
 0x32b   :  { %v739_v45 = vsub.f32 %v366_v2, %v717_v44 }
 0x32d   :  { %v747_v46 = vmul.f32 1.442695, %v739_v45 }
 0x32e   :  { %v720_v47 = vpop.xlane.xlu0 %719 }
 0x32f   :  { %3579 = vpow2.f32 %v747_v46  ;;  %v740_v48 = vsub.f32 %v415_v9, %v720_v47 }
 0x331   :  { %v749_v49 = vmul.f32 1.442695, %v740_v48 }
 0x333   :  { %3581 = vpow2.f32 %v749_v49 }
 0x339   :  { %v3580_v50 = vpop.eup %3579 }
 0x33a   :  { %v763_v51 = vsel %vm325_vm2, %v3580_v50, 0.0 }
 0x33b   :  { %764 = vadd.xlane.f32.xlu0 %v763_v51 }
 0x33d   :  { %v3582_v52 = vpop.eup %3581 }
 0x33e   :  { %v766_v53 = vsel %vm325_vm2, %v3582_v52, 0.0 }
 0x33f   :  { %767 = vadd.xlane.f32.xlu1 %v766_v53 }
 0x39d   :  { %v723_v54 = vpop.xlane.xlu0 %722  ;;  %v726_v55 = vpop.xlane.xlu1 %725 }
 0x39e   :  { %v741_v56 = vsub.f32 %v464_v14, %v723_v54  ;;  %v742_v59 = vsub.f32 %v513_v15, %v726_v55 }
 0x3a0   :  { %v751_v60 = vmul.f32 1.442695, %v741_v56  ;;  %v753_v61 = vmul.f32 1.442695, %v742_v59 }
 0x3a2   :  { %3583 = vpow2.f32 %v751_v60 }
 0x3a3   :  { %3585 = vpow2.f32 %v753_v61 }
 0x3a5   :  { %v729_v62 = vpop.xlane.xlu0 %728  ;;  %v732_v63 = vpop.xlane.xlu1 %731 }
 0x3a6   :  { %v743_v1 = vsub.f32 %v562_v24, %v729_v62  ;;  %v744_v2 = vsub.f32 %v611_v25, %v732_v63 }
 0x3a8   :  { %v755_v5 = vmul.f32 1.442695, %v743_v1  ;;  %v757_v6 = vmul.f32 1.442695, %v744_v2 }
 0x3aa   :  { %3587 = vpow2.f32 %v755_v5 }
 0x3ab   :  { %3589 = vpow2.f32 %v757_v6 }
 0x3ac   :  { %v3584_v7 = vpop.eup %3583 }
 0x3ad   :  { %v3586_v8 = vpop.eup %3585  ;;  %v735_v9 = vpop.xlane.xlu0 %734  ;;  %v769_v10 = vsel %vm325_vm2, %v3584_v7, 0.0 }
 0x3ae   :  { %v745_v11 = vsub.f32 %v660_v34, %v735_v9  ;;  %770 = vadd.xlane.f32.xlu0 %v769_v10  ;;  %v772_v12 = vsel %vm325_vm2, %v3586_v8, 0.0  ;;  %v738_v21 = vpop.xlane.xlu1 %737 }
 0x3af   :  { %773 = vadd.xlane.f32.xlu1 %v772_v12  ;;  %v746_v26 = vsub.f32 %v4100_v35, %v738_v21 }
 0x3b0   :  { %v759_v13 = vmul.f32 1.442695, %v745_v11 }
 0x3b1   :  { %v761_v57 = vmul.f32 1.442695, %v746_v26 }
 0x3b2   :  { %3591 = vpow2.f32 %v759_v13 }
 0x3b4   :  { %v4109_v14 = vpop.eup %3587 }
 0x3b5   :  { %v4111_v15 = vpop.eup %3589  ;;  %v775_v16 = vsel %vm325_vm2, %v4109_v14, 0.0 }
 0x3b6   :  { %776 = vadd.xlane.f32.xlu0 %v775_v16  ;;  %v778_v17 = vsel %vm325_vm2, %v4111_v15, 0.0 }
 0x3b7   :  { %779 = vadd.xlane.f32.xlu1 %v778_v17 }
 0x3bc   :  { %v4117_v18 = vpop.eup %3591 }
 0x3bd   :  { %v781_v19 = vsel %vm325_vm2, %v4117_v18, 0.0 }
 0x3be   :  { %782 = vadd.xlane.f32.xlu0 %v781_v19 }
 0x3c8   :  { %3486 = vrot.lane.b32.xlu1 %v3485_v20, %s3817_s25  ;;  %v765_v22 = vpop.xlane.xlu0 %764 }
 0x3c9   :  { %3593 = vrcp.f32 %v765_v22 }
 0x3cc   :  { %v768_v23 = vpop.xlane.xlu1 %767 }
 0x3cd   :  { %3595 = vrcp.f32 %v768_v23 }
 0x3ce   :  { %3597 = vpow2.f32 %v761_v57 }
 0x3d3   :  { %v3594_v24 = vpop.eup %3593 }
 0x3d4   :  { %v795_v25 = vmul.f32 %v3594_v24, %v3580_v50  ;;  %3481 = vrot.lane.b32.xlu0 %v3485_v20, %s3815_s19 }
 0x3d6   :  { %v803_v27 = vpack.c.bf16 %v795_v25, %v795_v25 }
 0x3d7   :  { %v3596_v28 = vpop.eup %3595 }
 0x3d8   :  { %v796_v29 = vmul.f32 %v3596_v28, %v3582_v52  ;;  %3233 = vmatmul.mubr.msk.bf16.vlgmr.msra.gmra.mrb[16].mxu0 %vm325_vm2, %v803_v27  ;;  %v4132_v30 = vpop.eup %3597  ;;  %v3559_v28 = vld [vmem:[%s4507_s6] sm:$0xff]  }
 0x3d9   :  { %3244 = vmatprep.mubr.msk.bf16.mxu0 %vm3813_vm0, %v3812_v0  ;;  %v784_v31 = vsel %vm325_vm2, %v4132_v30, 0.0 }
 0x3da   :  { %v804_v58 = vpack.c.bf16 %v796_v29, %v796_v29 }
 0x3dc   :  { %3239 = vmatmul.mubr.msk.bf16.vlgmr.msra.gmra.mrb[24].mxu1 %vm325_vm2, %v804_v58 }
 0x3dd   :  { %3250 = vmatprep.mubr.msk.bf16.mxu1 %vm3813_vm0, %v3812_v0 }
 0x3ec   :  { %785 = vadd.xlane.f32.xlu1 %v784_v31 }
 0x3fd   :  { %3491 = vrot.lane.b32.xlu1 %v3485_v20, %s3814_s16 }
 0x43b   :  { %v771_v32 = vpop.xlane.xlu0 %770 }
 0x43c   :  { %v774_v33 = vpop.xlane.xlu1 %773  ;;  %3599 = vrcp.f32 %v771_v32 }
 0x43d   :  { %3601 = vrcp.f32 %v774_v33 }
 0x443   :  { %v777_v34 = vpop.xlane.xlu0 %776 }
 0x444   :  { %v780_v35 = vpop.xlane.xlu1 %779  ;;  %3603 = vrcp.f32 %v777_v34 }
 0x445   :  { %3605 = vrcp.f32 %v780_v35 }
 0x446   :  { %v3600_v38 = vpop.eup %3599 }
 0x447   :  { %v3602_v39 = vpop.eup %3601  ;;  %v797_v45 = vmul.f32 %v3600_v38, %v3584_v7 }
 0x448   :  { %v3487_v37 = vpop.permute.xlu1 %3486  ;;  %v798_v46 = vmul.f32 %v3602_v39, %v3586_v8 }
 0x449   :  { %v3489_v41 = vunpack.i.h.bf16 %v3487_v37  ;;  %v3488_v42 = vunpack.i.l.bf16 %v3487_v37  ;;  %v805_v54 = vpack.c.bf16 %v797_v45, %v797_v45 }
 0x44a   :  { %v806_v55 = vpack.c.bf16 %v798_v46, %v798_v46 }
 0x44b   :  { %v783_v36 = vpop.xlane.xlu0 %782  ;;  %v319_v49 = vpack.c.bf16 %v3489_v41, %v3489_v41  ;;  %v318_v50 = vpack.c.bf16 %v3488_v42, %v3488_v42 }
 0x44c   :  { %3607 = vrcp.f32 %v783_v36 }
 0x44d   :  { %v1000_v59 = vsel %vm814_vm3, %v318_v50, 0  ;;  %v1046_v60 = vsel %vm814_vm3, %v319_v49, 0 }
 0x44e   :  { %v3604_v53 = vpop.eup %3603 }
 0x44f   :  { %v3482_v40 = vpop.permute.xlu0 %3481  ;;  %v3606_v56 = vpop.eup %3605  ;;  %v799_v61 = vmul.f32 %v3604_v53, %v4109_v14 }
 0x450   :  { %v3484_v43 = vunpack.i.h.bf16 %v3482_v40  ;;  %v3483_v44 = vunpack.i.l.bf16 %v3482_v40  ;;  %v800_v62 = vmul.f32 %v3606_v56, %v4111_v15 }
 0x451   :  { %v807_v63 = vpack.c.bf16 %v799_v61, %v799_v61 }
 0x452   :  { %v317_v47 = vpack.c.bf16 %v3484_v43, %v3484_v43  ;;  %v316_v48 = vpack.c.bf16 %v3483_v44, %v3483_v44  ;;  %v808_v1 = vpack.c.bf16 %v800_v62, %v800_v62  ;;  %v3560_v43 = vld [vmem:[%s4507_s6 + $0x8] sm:$0xff]  }
 0x454   :  { %v908_v51 = vsel %vm814_vm3, %v316_v48, 0  ;;  %v954_v52 = vsel %vm814_vm3, %v317_v47, 0 }
 0x455   :  { %3243 = vmatpush3.bf16.msra.mxu0 %v908_v51  ;;  %3249 = vmatpush3.bf16.msra.mxu1 %v954_v52 }
 0x456   :  { %3254 = vmatprep.subr.bf16.mxu0 %v3812_v0  ;;  %3260 = vmatprep.subr.bf16.mxu1 %v3812_v0  ;;  %v3608_v5 = vpop.eup %3607 }
 0x457   :  { %v801_v9 = vmul.f32 %v3608_v5, %v4117_v18 }
 0x458   :  { %3245 = vmatmul.mubr.msk.bf16.vlgmr.msra.gmra.mrb[20].mxu0 %vm325_vm2, %v805_v54  ;;  %3251 = vmatmul.mubr.msk.bf16.vlgmr.msra.gmra.mrb[28].mxu1 %vm325_vm2, %v806_v55 }
 0x459   :  { %3255 = vmatpush3.bf16.msra.mxu0 %v1000_v59  ;;  %3261 = vmatpush3.bf16.msra.mxu1 %v1046_v60  ;;  %v809_v15 = vpack.c.bf16 %v801_v9, %v801_v9 }
 0x45a   :  { %3256 = vmatprep.mubr.msk.bf16.mxu0 %vm3813_vm0, %v3812_v0  ;;  %3262 = vmatprep.mubr.msk.bf16.mxu1 %vm3813_vm0, %v3812_v0 }
 0x45b   :  { %3266 = vmatprep.subr.bf16.mxu0 %v3812_v0  ;;  %3272 = vmatprep.subr.bf16.mxu1 %v3812_v0 }
 0x460   :  { %3257 = vmatmul.mubr.msk.bf16.vlgmr.msra.gmra.mrb[24].mxu0 %vm325_vm2, %v807_v63  ;;  %3263 = vmatmul.mubr.msk.bf16.vlgmr.msra.gmra.mrb[32].mxu1 %vm325_vm2, %v808_v1 }
 0x461   :  { %3268 = vmatprep.mubr.msk.bf16.mxu0 %vm3813_vm0, %v3812_v0  ;;  %3274 = vmatprep.mubr.msk.bf16.mxu1 %vm3813_vm0, %v3812_v0 }
 0x479   :  { %v786_v2 = vpop.xlane.xlu1 %785 }
 0x47a   :  { %3609 = vrcp.f32 %v786_v2 }
 0x47d   :  { %v3492_v6 = vpop.permute.xlu1 %3491 }
 0x47e   :  { %v3494_v7 = vunpack.i.h.bf16 %v3492_v6  ;;  %v3493_v8 = vunpack.i.l.bf16 %v3492_v6 }
 0x480   :  { %v321_v10 = vpack.c.bf16 %v3494_v7, %v3494_v7  ;;  %v320_v11 = vpack.c.bf16 %v3493_v8, %v3493_v8 }
 0x482   :  { %v1092_v12 = vsel %vm814_vm3, %v320_v11, 0  ;;  %v1138_v13 = vsel %vm814_vm3, %v321_v10, 0  ;;  %v2981_v10 = vld [vmem:[#allocation7] ss:$0 sm:$0xff] }
 0x483   :  { %3267 = vmatpush3.bf16.msra.mxu0 %v1092_v12  ;;  %3273 = vmatpush3.bf16.msra.mxu1 %v1138_v13 }
 0x484   :  { %v3610_v14 = vpop.eup %3609  ;;  %3278 = vmatprep.subr.bf16.mxu0 %v3812_v0  ;;  %3286 = vmatprep.subr.bf16.mxu1 %v3812_v0 }
 0x485   :  { %v802_v16 = vmul.f32 %v3610_v14, %v4132_v30 }
 0x486   :  { %3269 = vmatmul.mubr.msk.bf16.vlgmr.msra.gmra.mrb[28].mxu0 %vm325_vm2, %v809_v15 }
 0x487   :  { %v810_v17 = vpack.c.bf16 %v802_v16, %v802_v16  ;;  %3282 = vmatprep.mubr.msk.bf16.mxu0 %vm3813_vm0, %v3812_v0  ;;  %3279 = vmatpush3.bf16.msra.mxu0 %v3559_v28 }
 0x488   :  { %3280 = vmatprep.subr.bf16.mxu0 %v3812_v0 }
 0x489   :  { %3275 = vmatmul.mubr.msk.bf16.vlgmr.msra.gmra.mrb[36].mxu1 %vm325_vm2, %v810_v17 }
 0x48a   :  { %3290 = vmatprep.mubr.msk.bf16.mxu1 %vm3813_vm0, %v3812_v0 }
 0x48b   :  { %3281 = vmatpush3.bf16.msra.mxu0 %v3560_v43  ;;  %v2986_v43 = vld [vmem:[%s4514_s13] ss:$0 sm:$0xff] }
 0x48c   :  { %3294 = vmatprep.subr.bf16.mxu0 %v3812_v0 }
 0x4ab   :  { %v852_v18 = vpop.f32.mrb[16].mxu0 }
 0x4ac   :  { %v3234_v19 = vpop.f32.mrb[17].mxu0 }
 0x4ad   :  { %v855_v20 = vpop.f32.mrb[18].mxu0 }
 0x4ae   :  { %v3235_v21 = vpop.f32.mrb[19].mxu0 }
 0x4af   :  { %v898_v22 = vpop.f32.mrb[24].mxu1 }
 0x4b0   :  { %v3240_v23 = vpop.f32.mrb[25].mxu1 }
 0x4b1   :  { %v901_v24 = vpop.f32.mrb[26].mxu1 }
 0x4b2   :  { %v3241_v25 = vpop.f32.mrb[27].mxu1 }
 0x52b   :  { %v944_v26 = vpop.f32.mrb[20].mxu0  ;;  %v990_v27 = vpop.f32.mrb[28].mxu1 }
 0x52c   :  { %v3495_v29 = vpack.i.bf16 %v990_v27, %v944_v26  ;;  %v3246_v57 = vpop.f32.mrb[21].mxu0  ;;  %v3252_v58 = vpop.f32.mrb[29].mxu1 }
 0x52d   :  { %v947_v30 = vpop.f32.mrb[22].mxu0  ;;  %v993_v31 = vpop.f32.mrb[30].mxu1  ;;  %v3561_v57 = vld [vmem:[#allocation8] sm:$0xff]  }
 0x52e   :  { %v3247_v32 = vpop.f32.mrb[23].mxu0  ;;  %3496 = vrot.lane.b32.xlu0 %v3495_v29, %s4527_s24  ;;  %v3253_v33 = vpop.f32.mrb[31].mxu1  ;;  %3287 = vmatpush3.bf16.msra.mxu1 %v3561_v57  ;;  %v3563_v58 = vld [vmem:[%s4511_s10] sm:$0xff]   ;;  %v3564_v30 = vld [vmem:[%s4511_s10 + $0x8] sm:$0xff]  }
 0x52f   :  { %3288 = vmatprep.subr.bf16.mxu1 %v3812_v0  ;;  %v2997_v57 = vld [vmem:[%s4515_s14] ss:$0 sm:$0xff] }
 0x533   :  { %v1036_v34 = vpop.f32.mrb[24].mxu0  ;;  %v1082_v35 = vpop.f32.mrb[32].mxu1 }
 0x534   :  { %v3500_v36 = vpack.i.bf16 %v1082_v35, %v1036_v34  ;;  %v3258_v37 = vpop.f32.mrb[25].mxu0  ;;  %v3264_v38 = vpop.f32.mrb[33].mxu1 }
 0x535   :  { %v1039_v39 = vpop.f32.mrb[26].mxu0  ;;  %v1085_v40 = vpop.f32.mrb[34].mxu1  ;;  %v2985_v38 = vld [vmem:[%s4513_s12] ss:$0 sm:$0xff] }
 0x536   :  { %v3259_v41 = vpop.f32.mrb[27].mxu0  ;;  %3501 = vrot.lane.b32.xlu1 %v3500_v36, %s3809_s23  ;;  %v3265_v42 = vpop.f32.mrb[35].mxu1 }
 0x559   :  { %v1128_v44 = vpop.f32.mrb[28].mxu0 }
 0x55a   :  { %v3270_v45 = vpop.f32.mrb[29].mxu0 }
 0x55b   :  { %v1131_v46 = vpop.f32.mrb[30].mxu0 }
 0x55c   :  { %v3271_v47 = vpop.f32.mrb[31].mxu0  ;;  %v1174_v48 = vpop.f32.mrb[36].mxu1 }
 0x55d   :  { %v3505_v49 = vpack.i.bf16 %v1174_v48, %v1128_v44  ;;  %v3276_v50 = vpop.f32.mrb[37].mxu1  ;;  %v3565_v48 = vld [vmem:[%s4511_s10 + $0x10] sm:$0xff]  }
 0x55e   :  { %v1177_v51 = vpop.f32.mrb[38].mxu1  ;;  %v2987_v50 = vld [vmem:[#allocation10] ss:$0 sm:$0xff] }
 0x55f   :  { %3506 = vrot.lane.b32.xlu0 %v3505_v49, %s3818_s30  ;;  %v3277_v52 = vpop.f32.mrb[39].mxu1  ;;  %v3566_v49 = vld [vmem:[%s4511_s10 + $0x18] sm:$0xff]  }
 0x5a0   :  { %v3497_v53 = vpop.permute.xlu0 %3496 }
 0x5a1   :  { %v3499_v55 = vunpack.i.h.bf16 %v3497_v53  ;;  %v3498_v56 = vunpack.i.l.bf16 %v3497_v53 }
 0x5a3   :  { %v1205_v62 = vsel %vm325_vm2, %v898_v22, %v3499_v55  ;;  %v1204_v63 = vsel %vm325_vm2, %v852_v18, %v3498_v56 }
 0x5a8   :  { %v3502_v54 = vpop.permute.xlu1 %3501 }
 0x5a9   :  { %v3504_v59 = vunpack.i.h.bf16 %v3502_v54  ;;  %v3503_v60 = vunpack.i.l.bf16 %v3502_v54 }
 0x5ab   :  { %v1208_v5 = vsel %vm1206_vm4, %v1205_v62, %v3504_v59  ;;  %v1207_v6 = vsel %vm1206_vm4, %v1204_v63, %v3503_v60  ;;  %v2991_v62 = vld [vmem:[%s4512_s11] ss:$0 sm:$0xff] }
 0x5d1   :  { %v3507_v61 = vpop.permute.xlu0 %3506 }
 0x5d2   :  { %v3509_v1 = vunpack.i.h.bf16 %v3507_v61  ;;  %v3508_v2 = vunpack.i.l.bf16 %v3507_v61 }
 0x5d4   :  { %v1211_v7 = vsel %vm1209_vm5, %v1208_v5, %v3509_v1  ;;  %v1210_v8 = vsel %vm1209_vm5, %v1207_v6, %v3508_v2 }
 0x5d5   :  { %v1212_v9 = vpack.c.bf16 %v1211_v7, %v1210_v8 }
 0x5d7   :  { %3283 = vmatmul.mubr.msk.bf16.vlgmr.msra.gmra.mrb[32].mxu0 %vm154_vm1, %v1212_v9 }
 0x5d8   :  { %3302 = vmatprep.mubr.msk.bf16.mxu0 %vm3813_vm0, %v3812_v0  ;;  %3295 = vmatpush3.bf16.msra.mxu0 %v3563_v58 }
 0x5d9   :  { %3296 = vmatprep.subr.bf16.mxu0 %v3812_v0 }
 0x5dc   :  { %3297 = vmatpush3.bf16.msra.mxu0 %v3564_v30  ;;  %v2998_v30 = vld [vmem:[%s4516_s15] ss:$0 sm:$0xff] }
 0x5dd   :  { %3298 = vmatprep.subr.bf16.mxu0 %v3812_v0 }
 0x5e0   :  { %3299 = vmatpush3.bf16.msra.mxu0 %v3565_v48 }
 0x5e1   :  { %3300 = vmatprep.subr.bf16.mxu0 %v3812_v0 }
 0x5e4   :  { %3301 = vmatpush3.bf16.msra.mxu0 %v3566_v49 }
 0x5e5   :  { %3322 = vmatprep.subr.bf16.mxu0 %v3812_v0 }
 0x6aa   :  { %v1273_v11 = vpop.f32.mrb[32].mxu0 }
 0x6ab   :  { %v1274_v12 = vadd.f32 %v2981_v10, %v1273_v11  ;;  %v3284_v13 = vpop.f32.mrb[33].mxu0 }
 0x6ac   :  { %v1276_v14 = vpop.f32.mrb[34].mxu0 }
 0x6ad   :  { %v1277_v15 = vadd.f32 %v2981_v10, %v1276_v14  ;;  %v3285_v16 = vpop.f32.mrb[35].mxu0  ;;  %v1280_v17 = vadd.f32 %v1274_v12, %v4001_v3 }
 0x6af   :  { %v1284_v18 = vsel %vm154_vm1, %v1280_v17, 0.0  ;;  %v1281_v19 = vadd.f32 %v1277_v15, %v4003_v4  ;;  %v3562_v4 = vld [vmem:[#allocation8 + $0x8] sm:$0xff]  }
 0x6b0   :  { %1285 = vadd.xlane.f32.xlu1 %v1284_v18  ;;  %3289 = vmatpush3.bf16.msra.mxu1 %v3562_v4 }
 0x6b1   :  { %v1287_v20 = vsel %vm154_vm1, %v1281_v19, 0.0  ;;  %3306 = vmatprep.subr.bf16.mxu1 %v3812_v0 }
 0x6b2   :  { %1288 = vadd.xlane.f32.xlu0 %v1287_v20 }
 0x73d   :  { %v1286_v21 = vpop.xlane.xlu1 %1285 }
 0x73e   :  { %v1291_v22 = vmul.f32 0.03125, %v1286_v21 }
 0x73f   :  { %v1289_v23 = vpop.xlane.xlu0 %1288 }
 0x740   :  { %v1293_v24 = vsub.f32 %v1280_v17, %v1291_v22  ;;  %v1292_v25 = vmul.f32 0.03125, %v1289_v23  ;;  %v3567_v22 = vld [vmem:[%s4503_s2 + $0x10] sm:$0xff]   ;;  %v3568_v23 = vld [vmem:[%s4503_s2 + $0x18] sm:$0xff]  }
 0x742   :  { %v1294_v26 = vsub.f32 %v1281_v19, %v1292_v25  ;;  %v1295_v27 = vmul.f32 %v1293_v24, %v1293_v24 }
 0x744   :  { %v1297_v28 = vsel %vm154_vm1, %v1295_v27, 0.0  ;;  %v1296_v29 = vmul.f32 %v1294_v26, %v1294_v26 }
 0x745   :  { %1298 = vadd.xlane.f32.xlu0 %v1297_v28 }
 0x746   :  { %v1300_v3 = vsel %vm154_vm1, %v1296_v29, 0.0 }
 0x747   :  { %1301 = vadd.xlane.f32.xlu1 %v1300_v3 }
 0x7d2   :  { %v1299_v31 = vpop.xlane.xlu0 %1298 }
 0x7d3   :  { %v1303_v32 = vmul.f32 0.03125, %v1299_v31 }
 0x7d4   :  { %v1302_v33 = vpop.xlane.xlu1 %1301 }
 0x7d5   :  { %v1305_v34 = vadd.f32 1e-05, %v1303_v32  ;;  %v1304_v35 = vmul.f32 0.03125, %v1302_v33 }
 0x7d7   :  { %3611 = vrsqrt.f32 %v1305_v34  ;;  %v1306_v36 = vadd.f32 1e-05, %v1304_v35 }
 0x7d9   :  { %3613 = vrsqrt.f32 %v1306_v36  ;;  %v3659_v36 = vld [vmem:[#allocation5] sm:$0xff] }
 0x7e1   :  { %v3612_v37 = vpop.eup %3611 }
 0x7e2   :  { %v1309_v39 = vmul.f32 %v3612_v37, %v1293_v24 }
 0x7e3   :  { %v3614_v40 = vpop.eup %3613 }
 0x7e4   :  { %v1317_v41 = vmul.f32 %v2985_v38, %v1309_v39  ;;  %v1310_v42 = vmul.f32 %v3614_v40, %v1294_v26  ;;  %v3569_v40 = vld [vmem:[%s4505_s4 + $0x10] sm:$0xff]  }
 0x7e6   :  { %v1318_v44 = vmul.f32 %v2985_v38, %v1310_v42  ;;  %v1325_v45 = vadd.f32 %v2986_v43, %v1317_v41  ;;  %v3660_v38 = vld [vmem:[#allocation5 + $0x8] sm:$0xff] }
 0x7e7   :  { %v3570_v42 = vld [vmem:[%s4505_s4 + $0x18] sm:$0xff]  }
 0x7e8   :  { %v1326_v46 = vadd.f32 %v2986_v43, %v1318_v44  ;;  %v3004_v44 = vld [vmem:[%s4504_s3 + $0x1] ss:$0 sm:$0xff] }
 0x7ea   :  { %v1327_v47 = vpack.c.bf16 %v1326_v46, %v1325_v45 }
 0x7ec   :  { %3291 = vmatmul.mubr.msk.bf16.vlgmr.msra.gmra.mrb[40].mxu1 %vm154_vm1, %v1327_v47 }
 0x7ed   :  { %3310 = vmatprep.mubr.msk.bf16.mxu1 %vm3813_vm0, %v3812_v0  ;;  %3307 = vmatpush3.bf16.msra.mxu1 %v3567_v22 }
 0x7ee   :  { %3308 = vmatprep.subr.bf16.mxu1 %v3812_v0 }
 0x7f1   :  { %3309 = vmatpush3.bf16.msra.mxu1 %v3568_v23 }
 0x7f2   :  { %3314 = vmatprep.subr.bf16.mxu1 %v3812_v0 }
 0x8bf   :  { %v1388_v51 = vpop.f32.mrb[40].mxu1 }
 0x8c0   :  { %v1389_v52 = vadd.f32 %v2987_v50, %v1388_v51  ;;  %v3292_v53 = vpop.f32.mrb[41].mxu1 }
 0x8c1   :  { %v1391_v54 = vpop.f32.mrb[42].mxu1 }
 0x8c2   :  { %v1392_v55 = vadd.f32 %v2987_v50, %v1391_v54  ;;  %v3293_v56 = vpop.f32.mrb[43].mxu1  ;;  %v1395_v59 = vmax.f32 %v1389_v52, 0.0  ;;  %v3013_v52 = vld [vmem:[%s4506_s5 + $0x1] ss:$0 sm:$0xff] }
 0x8c4   :  { %v1396_v60 = vmax.f32 %v1392_v55, 0.0 }
 0x8c6   :  { %v1397_v61 = vpack.c.bf16 %v1396_v60, %v1395_v59 }
 0x8c8   :  { %3303 = vmatmul.mubr.msk.bf16.vlgmr.msra.gmra.mrb[36].mxu0 %vm1437_vm6, %v1397_v61 }
 0x8c9   :  { %3324 = vmatprep.mubr.msk.bf16.mxu0 %vm3813_vm0, %v3812_v0 }
 0x99b   :  { %v1475_v63 = vpop.f32.mrb[36].mxu0 }
 0x99c   :  { %v1476_v1 = vadd.f32 %v2991_v62, %v1475_v63  ;;  %v3304_v2 = vpop.f32.mrb[37].mxu0 }
 0x99d   :  { %v1478_v5 = vpop.f32.mrb[38].mxu0 }
 0x99e   :  { %v1479_v6 = vadd.f32 %v2991_v62, %v1478_v5  ;;  %v3305_v7 = vpop.f32.mrb[39].mxu0  ;;  %v1482_v8 = vadd.f32 %v1476_v1, %v1325_v45 }
 0x9a0   :  { %v1486_v9 = vsel %vm154_vm1, %v1482_v8, 0.0  ;;  %v1483_v10 = vadd.f32 %v1479_v6, %v1326_v46 }
 0x9a1   :  { %1487 = vadd.xlane.f32.xlu0 %v1486_v9 }
 0x9a2   :  { %v1489_v11 = vsel %vm154_vm1, %v1483_v10, 0.0 }
 0x9a3   :  { %1490 = vadd.xlane.f32.xlu1 %v1489_v11 }
 0xa2e   :  { %v1488_v12 = vpop.xlane.xlu0 %1487 }
 0xa2f   :  { %v1492_v13 = vmul.f32 0.03125, %v1488_v12 }
 0xa30   :  { %v1491_v14 = vpop.xlane.xlu1 %1490 }
 0xa31   :  { %v1494_v15 = vsub.f32 %v1482_v8, %v1492_v13  ;;  %v1493_v16 = vmul.f32 0.03125, %v1491_v14 }
 0xa33   :  { %v1495_v17 = vsub.f32 %v1483_v10, %v1493_v16  ;;  %v1496_v18 = vmul.f32 %v1494_v15, %v1494_v15 }
 0xa35   :  { %v1498_v19 = vsel %vm154_vm1, %v1496_v18, 0.0  ;;  %v1497_v20 = vmul.f32 %v1495_v17, %v1495_v17 }
 0xa36   :  { %1499 = vadd.xlane.f32.xlu0 %v1498_v19 }
 0xa37   :  { %v1501_v21 = vsel %vm154_vm1, %v1497_v20, 0.0 }
 0xa38   :  { %1502 = vadd.xlane.f32.xlu1 %v1501_v21 }
 0xac3   :  { %v1500_v24 = vpop.xlane.xlu0 %1499 }
 0xac4   :  { %v1504_v25 = vmul.f32 0.03125, %v1500_v24 }
 0xac5   :  { %v1503_v26 = vpop.xlane.xlu1 %1502 }
 0xac6   :  { %v1506_v27 = vadd.f32 1e-05, %v1504_v25  ;;  %v1505_v28 = vmul.f32 0.03125, %v1503_v26 }
 0xac8   :  { %3615 = vrsqrt.f32 %v1506_v27  ;;  %v1507_v29 = vadd.f32 1e-05, %v1505_v28 }
 0xaca   :  { %3617 = vrsqrt.f32 %v1507_v29 }
 0xad2   :  { %v3616_v3 = vpop.eup %3615 }
 0xad3   :  { %v1510_v4 = vmul.f32 %v3616_v3, %v1494_v15 }
 0xad4   :  { %v3618_v58 = vpop.eup %3617 }
 0xad5   :  { %v1518_v31 = vmul.f32 %v2997_v57, %v1510_v4  ;;  %v1511_v32 = vmul.f32 %v3618_v58, %v1495_v17 }
 0xad7   :  { %v4248_v33 = vadd.f32 %v2998_v30, %v1518_v31  ;;  %v1519_v34 = vmul.f32 %v2997_v57, %v1511_v32 }
 0xad9   :  { %v4250_v35 = vadd.f32 %v2998_v30, %v1519_v34  ;;  %v1528_v37 = vadd.f32 %v3659_v36, %v4248_v33 }
 0xadb   :  { %v1529_v39 = vadd.f32 %v3660_v38, %v4250_v35  ;;  %v1531_v43 = vpack.c.bf16 %v4250_v35, %v4248_v33 }
 0xadd   :  { %v1530_v41 = vpack.c.bf16 %v1529_v39, %v1528_v37 }
 0xadf   :  { %3311 = vmatmul.mubr.msk.bf16.vlgmr.msra.gmra.mrb[44].mxu1 %vm154_vm1, %v1530_v41 }
 0xae0   :  { %3315 = vmatpush3.bf16.msra.mxu1 %v3569_v40  ;;  %3318 = vmatprep.mubr.msk.bf16.mxu1 %vm3813_vm0, %v3812_v0 }
 0xae1   :  { %3316 = vmatprep.subr.bf16.mxu1 %v3812_v0 }
 0xae4   :  { %3317 = vmatpush3.bf16.msra.mxu1 %v3570_v42 }
 0xae5   :  { %3328 = vmatprep.subr.bf16.mxu1 %v3812_v0 }
 0xae7   :  { %3319 = vmatmul.mubr.msk.bf16.vlgmr.msra.gmra.mrb[48].mxu1 %vm154_vm1, %v1531_v43 }
 0xae8   :  { %3330 = vmatprep.mubr.msk.bf16.mxu1 %vm3813_vm0, %v3812_v0 }
 0xbb2   :  { %v1594_v45 = vpop.f32.mrb[44].mxu1 }
 0xbb3   :  { %v3312_v46 = vpop.f32.mrb[45].mxu1  ;;  %v1595_v48 = vadd.f32 %v3004_v44, %v1594_v45 }
 0xbb4   :  { %v1597_v47 = vpop.f32.mrb[46].mxu1 }
 0xbb5   :  { %v1598_v49 = vadd.f32 %v3004_v44, %v1597_v47  ;;  %v3313_v50 = vpop.f32.mrb[47].mxu1  ;;  %v1690_v55 = vpack.c.bf16 %v1595_v48, %v1595_v48 }
 0xbb7   :  { %v3515_v51 = vpack.i.bf16 %v1598_v49, %v1595_v48  ;;  %v1691_v62 = vpack.c.bf16 %v1598_v49, %v1598_v49 }
 0xbb9   :  { %3516 = vrot.lane.b32.xlu1 %v3515_v51, %s3817_s25  ;;  %3511 = vrot.lane.b32.xlu0 %v3515_v51, %s3815_s19 }
 0xbba   :  { %v1663_v53 = vpop.f32.mrb[48].mxu1 }
 0xbbb   :  { %v3320_v54 = vpop.f32.mrb[49].mxu1  ;;  %v4278_v59 = vadd.f32 %v3013_v52, %v1663_v53 }
 0xbbc   :  { %v1666_v56 = vpop.f32.mrb[50].mxu1 }
 0xbbd   :  { %v4280_v60 = vadd.f32 %v3013_v52, %v1666_v56  ;;  %3521 = vrot.lane.b32.xlu1 %v3515_v51, %s3814_s16  ;;  %1727 = vrot.lane.b32.xlu0 %v1690_v55, %s3816_s21  ;;  %v3321_v61 = vpop.f32.mrb[51].mxu1  ;;  %v1718_v30 = vpack.c.bf16 %v4278_v59, %v4278_v59 }
 0xbbf   :  { %v4286_v63 = vpack.i.bf16 %v4280_v60, %v4278_v59  ;;  %v1719_v31 = vpack.c.bf16 %v4280_v60, %v4280_v60  ;;  %v2218_v32 = vsel %vm814_vm3, %v1718_v30, 0 }
 0xbc1   :  { %1776 = vrot.lane.b32.xlu1 %v1691_v62, %s3816_s21  ;;  %v2264_v34 = vsel %vm814_vm3, %v1719_v31, 0 }
 0xc2b   :  { %v3517_v1 = vpop.permute.xlu1 %3516  ;;  %v3512_v2 = vpop.permute.xlu0 %3511 }
 0xc2c   :  { %v3514_v5 = vunpack.i.h.bf16 %v3512_v2  ;;  %v3513_v6 = vunpack.i.l.bf16 %v3512_v2  ;;  %v3519_v7 = vunpack.i.h.bf16 %v3517_v1  ;;  %v3518_v8 = vunpack.i.l.bf16 %v3517_v1 }
 0xc2e   :  { %v1693_v9 = vpack.c.bf16 %v3514_v5, %v3514_v5  ;;  %v1692_v10 = vpack.c.bf16 %v3513_v6, %v3513_v6  ;;  %v1695_v14 = vpack.c.bf16 %v3519_v7, %v3519_v7  ;;  %v1694_v15 = vpack.c.bf16 %v3518_v8, %v3518_v8 }
 0xc2f   :  { %v3522_v11 = vpop.permute.xlu1 %3521  ;;  %v1728_v12 = vpop.permute.xlu0 %1727 }
 0xc30   :  { %v1733_v13 = vsel %vm325_vm2, %v1728_v12, 0  ;;  %1825 = vrot.lane.b32.xlu0 %v1692_v10, %s3816_s21  ;;  %1874 = vrot.lane.b32.xlu1 %v1693_v9, %s3816_s21  ;;  %v3523_v16 = vunpack.i.l.bf16 %v3522_v11  ;;  %v3524_v17 = vunpack.i.h.bf16 %v3522_v11 }
 0xc31   :  { %3323 = vmatpush3.bf16.xpose.msra.mxu0 %v1733_v13 }
 0xc32   :  { %3334 = vmatprep.subr.bf16.mxu0 %v3812_v0  ;;  %v1696_v20 = vpack.c.bf16 %v3523_v16, %v3523_v16  ;;  %v1697_v21 = vpack.c.bf16 %v3524_v17, %v3524_v17 }
 0xc33   :  { %v1777_v18 = vpop.permute.xlu1 %1776 }
 0xc34   :  { %v1782_v19 = vsel %vm325_vm2, %v1777_v18, 0  ;;  %1923 = vrot.lane.b32.xlu0 %v1694_v15, %s3816_s21  ;;  %1972 = vrot.lane.b32.xlu1 %v1695_v14, %s3816_s21 }
 0xc35   :  { %3329 = vmatpush3.bf16.xpose.msra.mxu1 %v1782_v19 }
 0xc36   :  { %3340 = vmatprep.subr.bf16.mxu1 %v3812_v0 }
 0xc38   :  { %3325 = vmatmul.mubr.msk.bf16.vlgmr.msra.gmra.mrb[40].mxu0 %vm325_vm2, %v1690_v55  ;;  %2021 = vrot.lane.b32.xlu0 %v1696_v20, %s3816_s21 }
 0xc39   :  { %2070 = vrot.lane.b32.xlu1 %v1697_v21, %s3816_s21  ;;  %3336 = vmatprep.mubr.msk.bf16.mxu0 %vm3813_vm0, %v3812_v0 }
 0xc3c   :  { %3331 = vmatmul.mubr.msk.bf16.vlgmr.msra.gmra.mrb[52].mxu1 %vm325_vm2, %v1691_v62 }
 0xc3d   :  { %3342 = vmatprep.mubr.msk.bf16.mxu1 %vm3813_vm0, %v3812_v0 }
 0xca2   :  { %v1826_v22 = vpop.permute.xlu0 %1825  ;;  %v1875_v23 = vpop.permute.xlu1 %1874 }
 0xca3   :  { %v1831_v24 = vsel %vm325_vm2, %v1826_v22, 0  ;;  %v1880_v25 = vsel %vm325_vm2, %v1875_v23, 0 }
 0xca4   :  { %3335 = vmatpush3.bf16.xpose.msra.mxu0 %v1831_v24  ;;  %3341 = vmatpush3.bf16.xpose.msra.mxu1 %v1880_v25 }
 0xca5   :  { %3346 = vmatprep.subr.bf16.mxu0 %v3812_v0  ;;  %3352 = vmatprep.subr.bf16.mxu1 %v3812_v0 }
 0xca6   :  { %v1924_v26 = vpop.permute.xlu0 %1923  ;;  %v1973_v27 = vpop.permute.xlu1 %1972 }
 0xca7   :  { %v1929_v28 = vsel %vm325_vm2, %v1924_v26, 0  ;;  %v1978_v29 = vsel %vm325_vm2, %v1973_v27, 0 }
 0xcaa   :  { %v2022_v3 = vpop.permute.xlu0 %2021 }
 0xcab   :  { %3337 = vmatmul.mubr.msk.bf16.vlgmr.msra.gmra.mrb[44].mxu0 %vm325_vm2, %v1692_v10  ;;  %3343 = vmatmul.mubr.msk.bf16.vlgmr.msra.gmra.mrb[56].mxu1 %vm325_vm2, %v1693_v9  ;;  %v2071_v57 = vpop.permute.xlu1 %2070  ;;  %v2027_v4 = vsel %vm325_vm2, %v2022_v3, 0 }
 0xcac   :  { %3347 = vmatpush3.bf16.xpose.msra.mxu0 %v1929_v28  ;;  %3353 = vmatpush3.bf16.xpose.msra.mxu1 %v1978_v29  ;;  %v2076_v58 = vsel %vm325_vm2, %v2071_v57, 0 }
 0xcad   :  { %3348 = vmatprep.mubr.msk.bf16.mxu0 %vm3813_vm0, %v3812_v0  ;;  %3354 = vmatprep.mubr.msk.bf16.mxu1 %vm3813_vm0, %v3812_v0 }
 0xcae   :  { %3358 = vmatprep.subr.bf16.mxu0 %v3812_v0  ;;  %3364 = vmatprep.subr.bf16.mxu1 %v3812_v0 }
 0xcb3   :  { %3349 = vmatmul.mubr.msk.bf16.vlgmr.msra.gmra.mrb[48].mxu0 %vm325_vm2, %v1694_v15  ;;  %3355 = vmatmul.mubr.msk.bf16.vlgmr.msra.gmra.mrb[60].mxu1 %vm325_vm2, %v1695_v14 }
 0xcb4   :  { %3359 = vmatpush3.bf16.xpose.msra.mxu0 %v2027_v4  ;;  %3365 = vmatpush3.bf16.xpose.msra.mxu1 %v2076_v58 }
 0xcb5   :  { %3360 = vmatprep.mubr.msk.bf16.mxu0 %vm3813_vm0, %v3812_v0  ;;  %3366 = vmatprep.mubr.msk.bf16.mxu1 %vm3813_vm0, %v3812_v0 }
 0xcb6   :  { %3370 = vmatprep.subr.bf16.mxu0 %v3812_v0  ;;  %3376 = vmatprep.subr.bf16.mxu1 %v3812_v0 }
 0xcbb   :  { %3361 = vmatmul.mubr.msk.bf16.vlgmr.msra.gmra.mrb[52].mxu0 %vm325_vm2, %v1696_v20  ;;  %3367 = vmatmul.mubr.msk.bf16.vlgmr.msra.gmra.mrb[64].mxu1 %vm325_vm2, %v1697_v21 }
 0xcbc   :  { %3371 = vmatpush3.bf16.msra.mxu0 %v2218_v32  ;;  %3377 = vmatpush3.bf16.msra.mxu1 %v2264_v34 }
 0xcbd   :  { %3378 = vmatprep.mubr.msk.bf16.mxu1 %vm3813_vm0, %v3812_v0  ;;  %3388 = vmatprep.subr.bf16.mxu1 %v3812_v0 }
 0xcbe   :  { %3372 = vmatprep.mubr.msk.bf16.mxu0 %vm3813_vm0, %v3812_v0  ;;  %3382 = vmatprep.subr.bf16.mxu0 %v3812_v0 }
 0xd0b   :  { %v1769_v36 = vpop.f32.mrb[40].mxu0 }
 0xd0c   :  { %v3326_v37 = vpop.f32.mrb[41].mxu0  ;;  %v2118_v38 = vsel %vm325_vm2, %v1769_v36, -inf }
 0xd0d   :  { %v1772_v39 = vpop.f32.mrb[42].mxu0  ;;  %2119 = vmax.xlane.f32.xlu0 %v2118_v38 }
 0xd0e   :  { %v3327_v40 = vpop.f32.mrb[43].mxu0 }
 0xd0f   :  { %v1818_v41 = vpop.f32.mrb[52].mxu1 }
 0xd10   :  { %v3332_v42 = vpop.f32.mrb[53].mxu1  ;;  %v2121_v43 = vsel %vm325_vm2, %v1818_v41, -inf }
 0xd11   :  { %2122 = vmax.xlane.f32.xlu1 %v2121_v43  ;;  %v1821_v44 = vpop.f32.mrb[54].mxu1 }
 0xd12   :  { %v3333_v45 = vpop.f32.mrb[55].mxu1 }
 0xd7e   :  { %v1867_v46 = vpop.f32.mrb[44].mxu0  ;;  %v1916_v47 = vpop.f32.mrb[56].mxu1 }
 0xd7f   :  { %v3338_v48 = vpop.f32.mrb[45].mxu0  ;;  %v3344_v49 = vpop.f32.mrb[57].mxu1  ;;  %v2124_v50 = vsel %vm325_vm2, %v1867_v46, -inf  ;;  %v2127_v55 = vsel %vm325_vm2, %v1916_v47, -inf }
 0xd80   :  { %2125 = vmax.xlane.f32.xlu0 %v2124_v50  ;;  %v1870_v51 = vpop.f32.mrb[46].mxu0  ;;  %v1919_v52 = vpop.f32.mrb[58].mxu1 }
 0xd81   :  { %v3339_v53 = vpop.f32.mrb[47].mxu0  ;;  %v3345_v54 = vpop.f32.mrb[59].mxu1 }
 0xd84   :  { %2128 = vmax.xlane.f32.xlu0 %v2127_v55 }
 0xd86   :  { %v1965_v56 = vpop.f32.mrb[48].mxu0  ;;  %v2014_v59 = vpop.f32.mrb[60].mxu1 }
 0xd87   :  { %v3350_v60 = vpop.f32.mrb[49].mxu0  ;;  %v3356_v61 = vpop.f32.mrb[61].mxu1  ;;  %v2130_v62 = vsel %vm325_vm2, %v1965_v56, -inf  ;;  %v2133_v1 = vsel %vm325_vm2, %v2014_v59, -inf }
 0xd88   :  { %v1968_v2 = vpop.f32.mrb[50].mxu0  ;;  %2131 = vmax.xlane.f32.xlu1 %v2130_v62  ;;  %2134 = vmax.xlane.f32.xlu0 %v2133_v1  ;;  %v2017_v5 = vpop.f32.mrb[62].mxu1 }
 0xd89   :  { %v3351_v6 = vpop.f32.mrb[51].mxu0  ;;  %v3357_v7 = vpop.f32.mrb[63].mxu1 }
 0xd8e   :  { %v2063_v8 = vpop.f32.mrb[52].mxu0  ;;  %v2112_v9 = vpop.f32.mrb[64].mxu1 }
 0xd8f   :  { %v3362_v10 = vpop.f32.mrb[53].mxu0  ;;  %v3368_v11 = vpop.f32.mrb[65].mxu1  ;;  %v2136_v12 = vsel %vm325_vm2, %v2063_v8, -inf  ;;  %v2139_v13 = vsel %vm325_vm2, %v2112_v9, -inf }
 0xd90   :  { %v2066_v14 = vpop.f32.mrb[54].mxu0  ;;  %2137 = vmax.xlane.f32.xlu1 %v2136_v12  ;;  %2140 = vmax.xlane.f32.xlu0 %v2139_v13  ;;  %v2115_v15 = vpop.f32.mrb[66].mxu1 }
 0xd91   :  { %v3363_v16 = vpop.f32.mrb[55].mxu0  ;;  %v3369_v17 = vpop.f32.mrb[67].mxu1 }
 0xd9a   :  { %v2120_v21 = vpop.xlane.xlu0 %2119 }
 0xd9b   :  { %v2142_v24 = vsub.f32 %v1769_v36, %v2120_v21 }
 0xd9d   :  { %v2150_v25 = vmul.f32 1.442695, %v2142_v24 }
 0xd9e   :  { %v2123_v18 = vpop.xlane.xlu1 %2122 }
 0xd9f   :  { %v2143_v19 = vsub.f32 %v1818_v41, %v2123_v18 }
 0xda1   :  { %v2152_v20 = vmul.f32 1.442695, %v2143_v19  ;;  %3526 = vrot.lane.b32.xlu1 %v4286_v63, %s3815_s19 }
 0xda3   :  { %3619 = vpow2.f32 %v2152_v20 }
 0xda4   :  { %3621 = vpow2.f32 %v2150_v25 }
 0xdad   :  { %v3620_v22 = vpop.eup %3619 }
 0xdae   :  { %v2169_v23 = vsel %vm325_vm2, %v3620_v22, 0.0  ;;  %v4354_v26 = vpop.eup %3621 }
 0xdaf   :  { %2170 = vadd.xlane.f32.xlu0 %v2169_v23  ;;  %v2166_v27 = vsel %vm325_vm2, %v4354_v26, 0.0 }
 0xdc5   :  { %2167 = vadd.xlane.f32.xlu1 %v2166_v27 }
 0xe0d   :  { %v2126_v28 = vpop.xlane.xlu0 %2125 }
 0xe0e   :  { %v2144_v29 = vsub.f32 %v1867_v46, %v2126_v28 }
 0xe10   :  { %v2154_v3 = vmul.f32 1.442695, %v2144_v29 }
 0xe11   :  { %v2129_v57 = vpop.xlane.xlu0 %2128 }
 0xe12   :  { %3623 = vpow2.f32 %v2154_v3  ;;  %v2145_v4 = vsub.f32 %v1916_v47, %v2129_v57 }
 0xe14   :  { %v2156_v58 = vmul.f32 1.442695, %v2145_v4 }
 0xe15   :  { %v2132_v30 = vpop.xlane.xlu1 %2131  ;;  %v2135_v31 = vpop.xlane.xlu0 %2134 }
 0xe16   :  { %3625 = vpow2.f32 %v2156_v58  ;;  %v2146_v32 = vsub.f32 %v1965_v56, %v2132_v30  ;;  %v2147_v34 = vsub.f32 %v2014_v59, %v2135_v31 }
 0xe18   :  { %v2158_v36 = vmul.f32 1.442695, %v2146_v32  ;;  %v2160_v37 = vmul.f32 1.442695, %v2147_v34 }
 0xe1a   :  { %3627 = vpow2.f32 %v2158_v36 }
 0xe1b   :  { %3629 = vpow2.f32 %v2160_v37 }
 0xe1c   :  { %v3624_v38 = vpop.eup %3623 }
 0xe1d   :  { %v2138_v39 = vpop.xlane.xlu1 %2137  ;;  %v2141_v40 = vpop.xlane.xlu0 %2140  ;;  %v2172_v41 = vsel %vm325_vm2, %v3624_v38, 0.0 }
 0xe1e   :  { %v2148_v42 = vsub.f32 %v2063_v8, %v2138_v39  ;;  %v2149_v43 = vsub.f32 %v2112_v9, %v2141_v40  ;;  %2173 = vadd.xlane.f32.xlu1 %v2172_v41 }
 0xe20   :  { %v3626_v44 = vpop.eup %3625  ;;  %v2162_v45 = vmul.f32 1.442695, %v2148_v42  ;;  %v2164_v46 = vmul.f32 1.442695, %v2149_v43 }
 0xe21   :  { %v2175_v47 = vsel %vm325_vm2, %v3626_v44, 0.0  ;;  %v3527_v59 = vpop.permute.xlu1 %3526 }
 0xe22   :  { %3631 = vpow2.f32 %v2162_v45  ;;  %2176 = vadd.xlane.f32.xlu0 %v2175_v47  ;;  %v3529_v60 = vunpack.i.h.bf16 %v3527_v59  ;;  %v3528_v7 = vunpack.i.l.bf16 %v3527_v59 }
 0xe23   :  { %3633 = vpow2.f32 %v2164_v46 }
 0xe24   :  { %v4360_v48 = vpop.eup %3627  ;;  %v1721_v62 = vpack.c.bf16 %v3529_v60, %v3529_v60  ;;  %v1720_v9 = vpack.c.bf16 %v3528_v7, %v3528_v7 }
 0xe25   :  { %v4362_v49 = vpop.eup %3629  ;;  %v2178_v50 = vsel %vm325_vm2, %v4360_v48, 0.0 }
 0xe26   :  { %2179 = vadd.xlane.f32.xlu1 %v2178_v50  ;;  %v2181_v51 = vsel %vm325_vm2, %v4362_v49, 0.0  ;;  %v2356_v5 = vsel %vm814_vm3, %v1721_v62, 0  ;;  %v2310_v11 = vsel %vm814_vm3, %v1720_v9, 0 }
 0xe27   :  { %2182 = vadd.xlane.f32.xlu0 %v2181_v51 }
 0xe2c   :  { %v4368_v52 = vpop.eup %3631 }
 0xe2d   :  { %v4370_v53 = vpop.eup %3633  ;;  %v2184_v54 = vsel %vm325_vm2, %v4368_v52, 0.0 }
 0xe2e   :  { %2185 = vadd.xlane.f32.xlu1 %v2184_v54  ;;  %v2187_v55 = vsel %vm325_vm2, %v4370_v53, 0.0 }
 0xe2f   :  { %2188 = vadd.xlane.f32.xlu0 %v2187_v55 }
 0xe3c   :  { %v2171_v56 = vpop.xlane.xlu0 %2170 }
 0xe3d   :  { %3635 = vrcp.f32 %v2171_v56 }
 0xe3f   :  { %3536 = vrot.lane.b32.xlu1 %v4286_v63, %s3814_s16 }
 0xe45   :  { %3531 = vrot.lane.b32.xlu0 %v4286_v63, %s3817_s25 }
 0xe47   :  { %v3636_v61 = vpop.eup %3635 }
 0xe48   :  { %v2199_v1 = vmul.f32 %v3636_v61, %v3620_v22 }
 0xe4a   :  { %v2207_v2 = vpack.c.bf16 %v2199_v1, %v2199_v1 }
 0xe4c   :  { %3379 = vmatmul.mubr.msk.bf16.vlgmr.msra.gmra.mrb[68].mxu1 %vm325_vm2, %v2207_v2 }
 0xe4d   :  { %3389 = vmatpush3.bf16.msra.mxu1 %v2356_v5  ;;  %3390 = vmatprep.mubr.msk.bf16.mxu1 %vm3813_vm0, %v3812_v0 }
 0xe4e   :  { %3400 = vmatprep.subr.bf16.mxu1 %v3812_v0 }
 0xe52   :  { %v2168_v6 = vpop.xlane.xlu1 %2167 }
 0xe53   :  { %3637 = vrcp.f32 %v2168_v6  ;;  %v3571_v6 = vld [vmem:[%s4507_s6 + $0x10] sm:$0xff]  }
 0xe5d   :  { %v3638_v8 = vpop.eup %3637 }
 0xe5e   :  { %v2198_v63 = vmul.f32 %v3638_v8, %v4354_v26  ;;  %v3572_v8 = vld [vmem:[%s4507_s6 + $0x18] sm:$0xff]  }
 0xe60   :  { %v2206_v10 = vpack.c.bf16 %v2198_v63, %v2198_v63 }
 0xe62   :  { %3373 = vmatmul.mubr.msk.bf16.vlgmr.msra.gmra.mrb[56].mxu0 %vm325_vm2, %v2206_v10 }
 0xe63   :  { %3383 = vmatpush3.bf16.msra.mxu0 %v2310_v11  ;;  %3384 = vmatprep.mubr.msk.bf16.mxu0 %vm3813_vm0, %v3812_v0 }
 0xe64   :  { %3394 = vmatprep.subr.bf16.mxu0 %v3812_v0 }
 0xeab   :  { %v2174_v12 = vpop.xlane.xlu1 %2173 }
 0xeac   :  { %3639 = vrcp.f32 %v2174_v12 }
 0xeaf   :  { %v2177_v13 = vpop.xlane.xlu0 %2176 }
 0xeb0   :  { %3641 = vrcp.f32 %v2177_v13 }
 0xeb3   :  { %v2180_v14 = vpop.xlane.xlu1 %2179 }
 0xeb4   :  { %v2183_v15 = vpop.xlane.xlu0 %2182  ;;  %3643 = vrcp.f32 %v2180_v14 }
 0xeb5   :  { %3645 = vrcp.f32 %v2183_v15 }
 0xeb6   :  { %v3640_v16 = vpop.eup %3639 }
 0xeb7   :  { %v2200_v17 = vmul.f32 %v3640_v16, %v3624_v38 }
 0xeb9   :  { %v2208_v18 = vpack.c.bf16 %v2200_v17, %v2200_v17 }
 0xeba   :  { %v3642_v19 = vpop.eup %3641 }
 0xebb   :  { %v2201_v20 = vmul.f32 %v3642_v19, %v3626_v44  ;;  %v2186_v21 = vpop.xlane.xlu1 %2185  ;;  %3385 = vmatmul.mubr.msk.bf16.vlgmr.msra.gmra.mrb[60].mxu0 %vm325_vm2, %v2208_v18 }
 0xebc   :  { %v2189_v22 = vpop.xlane.xlu0 %2188  ;;  %3396 = vmatprep.mubr.msk.bf16.mxu0 %vm3813_vm0, %v3812_v0  ;;  %3647 = vrcp.f32 %v2186_v21 }
 0xebd   :  { %v2209_v23 = vpack.c.bf16 %v2201_v20, %v2201_v20  ;;  %3649 = vrcp.f32 %v2189_v22 }
 0xebe   :  { %v3644_v24 = vpop.eup %3643 }
 0xebf   :  { %v3537_v25 = vpop.permute.xlu1 %3536  ;;  %3391 = vmatmul.mubr.msk.bf16.vlgmr.msra.gmra.mrb[72].mxu1 %vm325_vm2, %v2209_v23  ;;  %v3646_v26 = vpop.eup %3645  ;;  %v2202_v4 = vmul.f32 %v3644_v24, %v4360_v48 }
 0xec0   :  { %v3532_v27 = vpop.permute.xlu0 %3531  ;;  %3402 = vmatprep.mubr.msk.bf16.mxu1 %vm3813_vm0, %v3812_v0  ;;  %v3539_v28 = vunpack.i.h.bf16 %v3537_v25  ;;  %v3538_v29 = vunpack.i.l.bf16 %v3537_v25  ;;  %v2203_v58 = vmul.f32 %v3646_v26, %v4362_v49 }
 0xec1   :  { %v3534_v3 = vunpack.i.h.bf16 %v3532_v27  ;;  %v3533_v57 = vunpack.i.l.bf16 %v3532_v27  ;;  %v2210_v39 = vpack.c.bf16 %v2202_v4, %v2202_v4 }
 0xec2   :  { %v1725_v32 = vpack.c.bf16 %v3539_v28, %v3539_v28  ;;  %v1724_v34 = vpack.c.bf16 %v3538_v29, %v3538_v29  ;;  %v2211_v40 = vpack.c.bf16 %v2203_v58, %v2203_v58 }
 0xec3   :  { %v1723_v30 = vpack.c.bf16 %v3534_v3, %v3534_v3  ;;  %v1722_v31 = vpack.c.bf16 %v3533_v57, %v3533_v57 }
 0xec4   :  { %v2494_v42 = vsel %vm814_vm3, %v1724_v34, 0  ;;  %v2540_v43 = vsel %vm814_vm3, %v1725_v32, 0 }
 0xec5   :  { %v2402_v36 = vsel %vm814_vm3, %v1722_v31, 0  ;;  %v2448_v37 = vsel %vm814_vm3, %v1723_v30, 0 }
 0xec6   :  { %3395 = vmatpush3.bf16.msra.mxu0 %v2402_v36  ;;  %3401 = vmatpush3.bf16.msra.mxu1 %v2448_v37  ;;  %v3648_v38 = vpop.eup %3647 }
 0xec7   :  { %3406 = vmatprep.subr.bf16.mxu0 %v3812_v0  ;;  %3412 = vmatprep.subr.bf16.mxu1 %v3812_v0  ;;  %v3650_v41 = vpop.eup %3649  ;;  %v2204_v44 = vmul.f32 %v3648_v38, %v4368_v52 }
 0xec8   :  { %v2205_v45 = vmul.f32 %v3650_v41, %v4370_v53 }
 0xec9   :  { %3397 = vmatmul.mubr.msk.bf16.vlgmr.msra.gmra.mrb[64].mxu0 %vm325_vm2, %v2210_v39  ;;  %3403 = vmatmul.mubr.msk.bf16.vlgmr.msra.gmra.mrb[76].mxu1 %vm325_vm2, %v2211_v40  ;;  %v2212_v46 = vpack.c.bf16 %v2204_v44, %v2204_v44  ;;  %v3037_v40 = vld [vmem:[#allocation7 + $0x1] ss:$0 sm:$0xff] }
 0xeca   :  { %3407 = vmatpush3.bf16.msra.mxu0 %v2494_v42  ;;  %3413 = vmatpush3.bf16.msra.mxu1 %v2540_v43  ;;  %v2213_v47 = vpack.c.bf16 %v2205_v45, %v2205_v45 }
 0xecb   :  { %3408 = vmatprep.mubr.msk.bf16.mxu0 %vm3813_vm0, %v3812_v0  ;;  %3414 = vmatprep.mubr.msk.bf16.mxu1 %vm3813_vm0, %v3812_v0 }
 0xecc   :  { %3418 = vmatprep.subr.bf16.mxu0 %v3812_v0  ;;  %3426 = vmatprep.subr.bf16.mxu1 %v3812_v0 }
 0xed1   :  { %3409 = vmatmul.mubr.msk.bf16.vlgmr.msra.gmra.mrb[68].mxu0 %vm325_vm2, %v2212_v46  ;;  %3415 = vmatmul.mubr.msk.bf16.vlgmr.msra.gmra.mrb[80].mxu1 %vm325_vm2, %v2213_v47 }
 0xed2   :  { %3422 = vmatprep.mubr.msk.bf16.mxu0 %vm3813_vm0, %v3812_v0  ;;  %3430 = vmatprep.mubr.msk.bf16.mxu1 %vm3813_vm0, %v3812_v0 }
 0xed3   :  { %3419 = vmatpush3.bf16.msra.mxu0 %v3571_v6 }
 0xed4   :  { %3420 = vmatprep.subr.bf16.mxu0 %v3812_v0 }
 0xed7   :  { %3421 = vmatpush3.bf16.msra.mxu0 %v3572_v8 }
 0xed8   :  { %3434 = vmatprep.subr.bf16.mxu0 %v3812_v0 }
 0xf1f   :  { %v2300_v48 = vpop.f32.mrb[68].mxu1 }
 0xf20   :  { %v3380_v49 = vpop.f32.mrb[69].mxu1 }
 0xf21   :  { %v2303_v50 = vpop.f32.mrb[70].mxu1 }
 0xf22   :  { %v3381_v51 = vpop.f32.mrb[71].mxu1 }
 0xf35   :  { %v2254_v52 = vpop.f32.mrb[56].mxu0 }
 0xf36   :  { %v3374_v53 = vpop.f32.mrb[57].mxu0 }
 0xf37   :  { %v2257_v54 = vpop.f32.mrb[58].mxu0 }
 0xf38   :  { %v3375_v55 = vpop.f32.mrb[59].mxu0 }
 0xf8e   :  { %v2346_v56 = vpop.f32.mrb[60].mxu0 }
 0xf8f   :  { %v3386_v59 = vpop.f32.mrb[61].mxu0 }
 0xf90   :  { %v2349_v60 = vpop.f32.mrb[62].mxu0 }
 0xf91   :  { %v3387_v61 = vpop.f32.mrb[63].mxu0 }
 0xf92   :  { %v2392_v62 = vpop.f32.mrb[72].mxu1 }
 0xf93   :  { %v3540_v1 = vpack.i.bf16 %v2392_v62, %v2346_v56  ;;  %v3392_v2 = vpop.f32.mrb[73].mxu1  ;;  %v3573_v62 = vld [vmem:[#allocation8 + $0x10] sm:$0xff]  }
 0xf94   :  { %v2395_v5 = vpop.f32.mrb[74].mxu1  ;;  %3427 = vmatpush3.bf16.msra.mxu1 %v3573_v62  ;;  %v3576_v2 = vld [vmem:[%s4511_s10 + $0x28] sm:$0xff]   ;;  %v3067_v62 = vld [vmem:[%s4516_s15 + $0x1] ss:$0 sm:$0xff] }
 0xf95   :  { %3541 = vrot.lane.b32.xlu1 %v3540_v1, %s4527_s24  ;;  %v3393_v7 = vpop.f32.mrb[75].mxu1  ;;  %3428 = vmatprep.subr.bf16.mxu1 %v3812_v0  ;;  %v3575_v1 = vld [vmem:[%s4511_s10 + $0x20] sm:$0xff]  }
 0xf9c   :  { %v2438_v9 = vpop.f32.mrb[64].mxu0  ;;  %v2484_v63 = vpop.f32.mrb[76].mxu1 }
 0xf9d   :  { %v3545_v10 = vpack.i.bf16 %v2484_v63, %v2438_v9  ;;  %v3398_v11 = vpop.f32.mrb[65].mxu0  ;;  %v3404_v12 = vpop.f32.mrb[77].mxu1 }
 0xf9e   :  { %v2441_v13 = vpop.f32.mrb[66].mxu0  ;;  %v2487_v14 = vpop.f32.mrb[78].mxu1  ;;  %v3043_v12 = vld [vmem:[%s4513_s12 + $0x1] ss:$0 sm:$0xff] }
 0xf9f   :  { %v3399_v15 = vpop.f32.mrb[67].mxu0  ;;  %3546 = vrot.lane.b32.xlu0 %v3545_v10, %s3809_s23  ;;  %v3405_v16 = vpop.f32.mrb[79].mxu1 }
 0xfa0   :  { %v3044_v16 = vld [vmem:[%s4514_s13 + $0x1] ss:$0 sm:$0xff] }
 0xfa4   :  { %v2530_v17 = vpop.f32.mrb[68].mxu0  ;;  %v2576_v18 = vpop.f32.mrb[80].mxu1 }
 0xfa5   :  { %v3550_v19 = vpack.i.bf16 %v2576_v18, %v2530_v17  ;;  %v3410_v20 = vpop.f32.mrb[69].mxu0  ;;  %v3416_v21 = vpop.f32.mrb[81].mxu1 }
 0xfa6   :  { %v2533_v22 = vpop.f32.mrb[70].mxu0  ;;  %v2579_v23 = vpop.f32.mrb[82].mxu1  ;;  %v3577_v21 = vld [vmem:[%s4511_s10 + $0x30] sm:$0xff]  }
 0xfa7   :  { %v3411_v24 = vpop.f32.mrb[71].mxu0  ;;  %3551 = vrot.lane.b32.xlu1 %v3550_v19, %s3818_s30  ;;  %v3417_v25 = vpop.f32.mrb[83].mxu1  ;;  %v3578_v22 = vld [vmem:[%s4511_s10 + $0x38] sm:$0xff]   ;;  %v3045_v23 = vld [vmem:[#allocation10 + $0x1] ss:$0 sm:$0xff] }
0x1007   :  { %v3542_v26 = vpop.permute.xlu1 %3541 }
0x1008   :  { %v3544_v28 = vunpack.i.h.bf16 %v3542_v26  ;;  %v3543_v29 = vunpack.i.l.bf16 %v3542_v26 }
0x100a   :  { %v2607_v58 = vsel %vm325_vm2, %v2300_v48, %v3544_v28  ;;  %v2606_v30 = vsel %vm325_vm2, %v2254_v52, %v3543_v29 }
0x1011   :  { %v3547_v27 = vpop.permute.xlu0 %3546 }
0x1012   :  { %v3549_v3 = vunpack.i.h.bf16 %v3547_v27  ;;  %v3548_v57 = vunpack.i.l.bf16 %v3547_v27 }
0x1014   :  { %v2609_v34 = vsel %vm1206_vm4, %v2607_v58, %v3549_v3  ;;  %v2608_v36 = vsel %vm1206_vm4, %v2606_v30, %v3548_v57 }
0x1019   :  { %v3552_v4 = vpop.permute.xlu1 %3551 }
0x101a   :  { %v3554_v31 = vunpack.i.h.bf16 %v3552_v4  ;;  %v3553_v32 = vunpack.i.l.bf16 %v3552_v4 }
0x101c   :  { %v2611_v37 = vsel %vm1209_vm5, %v2609_v34, %v3554_v31  ;;  %v2610_v38 = vsel %vm1209_vm5, %v2608_v36, %v3553_v32 }
0x101d   :  { %v2612_v39 = vpack.c.bf16 %v2611_v37, %v2610_v38 }
0x101f   :  { %3423 = vmatmul.mubr.msk.bf16.vlgmr.msra.gmra.mrb[72].mxu0 %vm154_vm1, %v2612_v39 }
0x1020   :  { %3442 = vmatprep.mubr.msk.bf16.mxu0 %vm3813_vm0, %v3812_v0  ;;  %3435 = vmatpush3.bf16.msra.mxu0 %v3575_v1 }
0x1021   :  { %3436 = vmatprep.subr.bf16.mxu0 %v3812_v0 }
0x1024   :  { %3437 = vmatpush3.bf16.msra.mxu0 %v3576_v2 }
0x1025   :  { %3438 = vmatprep.subr.bf16.mxu0 %v3812_v0 }
0x1028   :  { %3439 = vmatpush3.bf16.msra.mxu0 %v3577_v21 }
0x1029   :  { %3440 = vmatprep.subr.bf16.mxu0 %v3812_v0  ;;  %v3058_v0 = vld [vmem:[%s4512_s11 + $0x1] ss:$0 sm:$0xff] }
0x102c   :  { %3441 = vmatpush3.bf16.msra.mxu0 %v3578_v22 }
0x10f2   :  { %v2675_v41 = vpop.f32.mrb[72].mxu0 }
0x10f3   :  { %v2676_v42 = vadd.f32 %v3037_v40, %v2675_v41  ;;  %v3424_v43 = vpop.f32.mrb[73].mxu0 }
0x10f4   :  { %v2678_v44 = vpop.f32.mrb[74].mxu0 }
0x10f5   :  { %v2679_v45 = vadd.f32 %v3037_v40, %v2678_v44  ;;  %v3425_v46 = vpop.f32.mrb[75].mxu0  ;;  %v2682_v47 = vadd.f32 %v2676_v42, %v4248_v33 }
0x10f7   :  { %v2688_v48 = vsel %vm154_vm1, %v2682_v47, 0.0  ;;  %v2683_v49 = vadd.f32 %v2679_v45, %v4250_v35  ;;  %v3574_v35 = vld [vmem:[#allocation8 + $0x18] sm:$0xff]  }
0x10f8   :  { %2689 = vadd.xlane.f32.xlu0 %v2688_v48  ;;  %3429 = vmatpush3.bf16.msra.mxu1 %v3574_v35 }
0x10f9   :  { %v2691_v50 = vsel %vm154_vm1, %v2683_v49, 0.0 }
0x10fa   :  { %2692 = vadd.xlane.f32.xlu1 %v2691_v50 }
0x1185   :  { %v2690_v51 = vpop.xlane.xlu0 %2689 }
0x1186   :  { %v2694_v52 = vmul.f32 0.03125, %v2690_v51 }
0x1187   :  { %v2693_v53 = vpop.xlane.xlu1 %2692 }
0x1188   :  { %v2696_v54 = vsub.f32 %v2682_v47, %v2694_v52  ;;  %v2695_v55 = vmul.f32 0.03125, %v2693_v53 }
0x118a   :  { %v2697_v56 = vsub.f32 %v2683_v49, %v2695_v55  ;;  %v2698_v59 = vmul.f32 %v2696_v54, %v2696_v54 }
0x118c   :  { %v2700_v60 = vsel %vm154_vm1, %v2698_v59, 0.0  ;;  %v2699_v61 = vmul.f32 %v2697_v56, %v2697_v56 }
0x118d   :  { %2701 = vadd.xlane.f32.xlu0 %v2700_v60  ;;  %v3066_v60 = vld [vmem:[%s4515_s14 + $0x1] ss:$0 sm:$0xff] }
0x118e   :  { %v2703_v33 = vsel %vm154_vm1, %v2699_v61, 0.0 }
0x1191   :  { %2704 = vadd.xlane.f32.xlu0 %v2703_v33 }
0x121a   :  { %v2702_v5 = vpop.xlane.xlu0 %2701 }
0x121b   :  { %v2706_v6 = vmul.f32 0.03125, %v2702_v5 }
0x121d   :  { %v2708_v7 = vadd.f32 1e-05, %v2706_v6 }
0x121e   :  { %v2705_v8 = vpop.xlane.xlu0 %2704 }
0x121f   :  { %3651 = vrsqrt.f32 %v2708_v7  ;;  %v2707_v9 = vmul.f32 0.03125, %v2705_v8 }
0x1221   :  { %v2709_v63 = vadd.f32 1e-05, %v2707_v9 }
0x1223   :  { %3653 = vrsqrt.f32 %v2709_v63 }
0x1229   :  { %v3652_v10 = vpop.eup %3651 }
0x122a   :  { %v2712_v11 = vmul.f32 %v3652_v10, %v2696_v54 }
0x122c   :  { %v2720_v14 = vmul.f32 %v3043_v12, %v2712_v11 }
0x122d   :  { %v3654_v13 = vpop.eup %3653 }
0x122e   :  { %v2713_v15 = vmul.f32 %v3654_v13, %v2697_v56  ;;  %v2728_v18 = vadd.f32 %v3044_v16, %v2720_v14 }
0x1230   :  { %v2721_v17 = vmul.f32 %v3043_v12, %v2713_v15 }
0x1232   :  { %v2729_v19 = vadd.f32 %v3044_v16, %v2721_v17 }
0x1234   :  { %v2730_v20 = vpack.c.bf16 %v2729_v19, %v2728_v18 }
0x1236   :  { %3431 = vmatmul.mubr.msk.bf16.vlgmr.msra.gmra.mrb[84].mxu1 %vm154_vm1, %v2730_v20 }
0x1309   :  { %v2793_v24 = vpop.f32.mrb[84].mxu1 }
0x130a   :  { %v2794_v25 = vadd.f32 %v3045_v23, %v2793_v24  ;;  %v3432_v26 = vpop.f32.mrb[85].mxu1 }
0x130b   :  { %v2796_v27 = vpop.f32.mrb[86].mxu1 }
0x130c   :  { %v2797_v28 = vadd.f32 %v3045_v23, %v2796_v27  ;;  %v3433_v29 = vpop.f32.mrb[87].mxu1  ;;  %v2800_v3 = vmax.f32 %v2794_v25, 0.0 }
0x130e   :  { %v2801_v57 = vmax.f32 %v2797_v28, 0.0 }
0x1310   :  { %v2802_v4 = vpack.c.bf16 %v2801_v57, %v2800_v3 }
0x1312   :  { %3443 = vmatmul.mubr.msk.bf16.vlgmr.msra.gmra.mrb[76].mxu0 %vm1437_vm6, %v2802_v4 }
0x13e5   :  { %v2881_v58 = vpop.f32.mrb[76].mxu0 }
0x13e6   :  { %v2882_v30 = vadd.f32 %v3058_v0, %v2881_v58  ;;  %v3444_v31 = vpop.f32.mrb[77].mxu0 }
0x13e7   :  { %v2884_v32 = vpop.f32.mrb[78].mxu0 }
0x13e8   :  { %v2885_v34 = vadd.f32 %v3058_v0, %v2884_v32  ;;  %v3445_v36 = vpop.f32.mrb[79].mxu0  ;;  %v2888_v37 = vadd.f32 %v2882_v30, %v2728_v18 }
0x13ea   :  { %v2894_v38 = vsel %vm154_vm1, %v2888_v37, 0.0  ;;  %v2889_v39 = vadd.f32 %v2885_v34, %v2729_v19 }
0x13eb   :  { %2895 = vadd.xlane.f32.xlu1 %v2894_v38 }
0x13ec   :  { %v2897_v40 = vsel %vm154_vm1, %v2889_v39, 0.0 }
0x13ed   :  { %2898 = vadd.xlane.f32.xlu0 %v2897_v40 }
0x1478   :  { %v2896_v41 = vpop.xlane.xlu1 %2895 }
0x1479   :  { %v2900_v42 = vmul.f32 0.03125, %v2896_v41 }
0x147a   :  { %v2899_v43 = vpop.xlane.xlu0 %2898 }
0x147b   :  { %v2902_v44 = vsub.f32 %v2888_v37, %v2900_v42  ;;  %v2901_v45 = vmul.f32 0.03125, %v2899_v43 }
0x147d   :  { %v2903_v46 = vsub.f32 %v2889_v39, %v2901_v45  ;;  %v2904_v47 = vmul.f32 %v2902_v44, %v2902_v44 }
0x147f   :  { %v2906_v48 = vsel %vm154_vm1, %v2904_v47, 0.0  ;;  %v2905_v49 = vmul.f32 %v2903_v46, %v2903_v46 }
0x1480   :  { %2907 = vadd.xlane.f32.xlu1 %v2906_v48 }
0x1481   :  { %v2909_v50 = vsel %vm154_vm1, %v2905_v49, 0.0 }
0x1482   :  { %2910 = vadd.xlane.f32.xlu0 %v2909_v50 }
0x150d   :  { %v2908_v51 = vpop.xlane.xlu1 %2907 }
0x150e   :  { %v2912_v52 = vmul.f32 0.03125, %v2908_v51 }
0x150f   :  { %v2911_v53 = vpop.xlane.xlu0 %2910 }
0x1510   :  { %v2914_v54 = vadd.f32 1e-05, %v2912_v52  ;;  %v2913_v55 = vmul.f32 0.03125, %v2911_v53 }
0x1512   :  { %3655 = vrsqrt.f32 %v2914_v54  ;;  %v2915_v56 = vadd.f32 1e-05, %v2913_v55 }
0x1514   :  { %3657 = vrsqrt.f32 %v2915_v56 }
0x151c   :  { %v3656_v59 = vpop.eup %3655 }
0x151d   :  { %v2918_v61 = vmul.f32 %v3656_v59, %v2902_v44 }
0x151e   :  { %v3658_v33 = vpop.eup %3657 }
0x151f   :  { %v2919_v35 = vmul.f32 %v3658_v33, %v2903_v46  ;;  %v2926_v1 = vmul.f32 %v3066_v60, %v2918_v61 }
0x1521   :  { %v2927_v2 = vmul.f32 %v3066_v60, %v2919_v35  ;;  %v2934_v5 = vadd.f32 %v3067_v62, %v2926_v1 }
0x1523   :  { %v2935_v6 = vadd.f32 %v3067_v62, %v2927_v2  ;;  %2936 = vst.msk [vmem:[#allocation11] sm:$0xff] %vm154_vm1, %v2934_v5 }
0x1525   :  { %2937 = vst.msk [vmem:[#allocation11 + $0x8] sm:$0xff] %vm154_vm1, %v2935_v6 }
0x1526   :  { %3782 = shalt.err (!%p3779_p2)
}
0x1527   :  { %s4529_s4 = sld [smem:[#allocation17_spill]] }
0x152d   :  { %s3783_s17 = scalar_lea.hbm %s4529_s4, 256 }
0x152e   :  { %p3784_p3 = scmp.ne.s32.totalorder %s4529_s4, %s3783_s17  ;;  %p3787_p4 = scmp.lt.u32.totalorder %s3783_s17, %s4529_s4 }
0x1530   :  { %p3789_p5 = pnand %p3787_p4, %p3784_p3 }
0x1532   :  { %3792 = shalt.err (!%p3789_p5)
}
0x1533   :  { %2949 = dma.vmem_to_hbm [thread:$0]  %s2944_s8, 256, %s4529_s4, [#allocation4], %s4528_s1, %s4528_s1, %s4527_s24  }
0x1534   :  { %3799 = dma.done.wait [#allocation4], 256  }
0x1535   :  { %3800 = vsyncadd [#allocation4], 4294967040 }
0x1536   :  { %2953 = vsyncpa [#allocation3], 1 }
0x1537   :  { %2954 = vsyncpa [#allocation6], 1 }
0x1538   :  { %2955 = vsyncpa [#allocation9], 1 }
0x1539   :  { %2956 = vsyncpa [#allocation4], 1 }

</bundles_post_ra>
